<compile_context>
chip_gen: v7x
topology: tpu7x:2x2x1
jax: 0.10.0
libtpu: 0.0.40
codegen_flags: <defaults>
</compile_context>

<pallas_src>
import jax
import jax.numpy as jnp
from jax import lax
from jax.experimental import pallas as pl
from jax.experimental.pallas import tpu as pltpu

_LANES = 128          # vreg lane width; also the (zero-padded) MXU contraction dim
_TP = 256             # query-tile rows
_TQ = 512             # target-tile columns (multiple of _LANES)
_BIG = 1e30           # sentinel squared distance for padded targets


def _round_up(x, m):
    return ((x + m - 1) // m) * m


# --------------------------------------------------------------------------
# Pallas kernel: directed chamfer partial sums.
# --------------------------------------------------------------------------
def _chamfer_kernel(cnt_ref, qd_ref, td_ref, tn_ref, out_ref, minacc_ref):
    """grid = (query tiles [parallel], target tiles [arbitrary]).

    cnt_ref : SMEM (2,) int32  -> [num_valid_queries, num_valid_targets]
    qd_ref  : VMEM (TP, 128)   -> lane0=y, lane1=x, lane2=|q|^2, lane3=valid, rest 0
    td_ref  : VMEM (128, TQ)   -> row0=-2y, row1=-2x, rest 0
    tn_ref  : VMEM (1, TQ)     -> |t|^2  (+ BIG on padded targets)
    out_ref : VMEM (1, 128)    -> per-query-tile partial sum in lane 0
    minacc  : VMEM (TP, 128)   -> running elementwise min of squared distances
    """
    p = pl.program_id(0)
    q = pl.program_id(1)
    tp = qd_ref.shape[0]
    tq = td_ref.shape[1]
    n_query = cnt_ref[0]
    n_target = cnt_ref[1]

    @pl.when(q == 0)
    def _init():
        minacc_ref[...] = jnp.full((tp, _LANES), _BIG, dtype=jnp.float32)

    p_active = p * tp < n_query
    q_active = q * tq < n_target

    @pl.when(jnp.logical_and(p_active, q_active))
    def _compute():
        qall = qd_ref[...]                                   # (tp, 128)
        # cross[i, j] = -2 * (y_i * y_j + x_i * x_j); unused lanes/rows are 0.
        cross = jnp.dot(qall, td_ref[...],
                        preferred_element_type=jnp.float32)  # (tp, tq)  MXU
        qn = qall[:, 2:3]                                    # (tp, 1)
        d2 = cross + qn + tn_ref[...]                        # ||q - t||^2 (+BIG pad)
        # Fold into the running min with elementwise VALU mins (no XLU traffic).
        acc = minacc_ref[...]
        for c in range(tq // _LANES):
            acc = jnp.minimum(acc, d2[:, c * _LANES:(c + 1) * _LANES])
        minacc_ref[...] = acc

    @pl.when(q == pl.num_programs(1) - 1)
    def _finalize():
        row_min = jnp.min(minacc_ref[...], axis=1, keepdims=True)   # (tp, 1)
        # clamp: the expansion can round slightly negative for coincident points
        d = jnp.sqrt(jnp.maximum(row_min, 0.0))
        qmask = qd_ref[:, 3:4]                                      # (tp, 1)
        val = jnp.sum(d * qmask, keepdims=True)                     # (1, 1)
        lane = lax.broadcasted_iota(jnp.int32, (1, _LANES), 1)
        out_ref[...] = jnp.where(lane == 0, val, 0.0)


def _directed_chamfer_sum(qd, n_query, td, tn, n_target):
    """sum over valid queries of min over valid targets of Euclidean distance."""
    npad_q = qd.shape[0]
    npad_t = td.shape[1]
    gp = npad_q // _TP
    gq = npad_t // _TQ
    cnt = jnp.stack([n_query, n_target]).astype(jnp.int32)

    cost = pl.CostEstimate(
        flops=int(2 * _LANES * npad_q * npad_t + 4 * npad_q * npad_t),
        transcendentals=int(npad_q),
        bytes_accessed=int(4 * (qd.size + td.size + tn.size + gp * _LANES)),
    )

    out = pl.pallas_call(
        _chamfer_kernel,
        out_shape=jax.ShapeDtypeStruct((1, gp * _LANES), jnp.float32),
        grid_spec=pltpu.PrefetchScalarGridSpec(
            num_scalar_prefetch=1,
            grid=(gp, gq),
            in_specs=[
                pl.BlockSpec((_TP, _LANES), lambda p, q, c: (p, 0)),
                pl.BlockSpec((_LANES, _TQ), lambda p, q, c: (0, q)),
                pl.BlockSpec((1, _TQ), lambda p, q, c: (0, q)),
            ],
            out_specs=pl.BlockSpec((1, _LANES), lambda p, q, c: (0, p)),
            scratch_shapes=[pltpu.VMEM((_TP, _LANES), jnp.float32)],
        ),
        compiler_params=pltpu.CompilerParams(
            dimension_semantics=("parallel", "arbitrary")),
        cost_estimate=cost,
    )(cnt, qd, td, tn)
    return jnp.sum(out)


# --------------------------------------------------------------------------
# Wrapper-side preprocessing (not the hot path).
# --------------------------------------------------------------------------
def _boundary(x, connectivity):
    """S = x - binary_erosion(x, generate_binary_structure(2, connectivity)).

    scipy binary_erosion default border_value=0 -> out-of-image neighbours
    count as background.
    """
    xb = x != 0
    h, w = xb.shape
    p = jnp.pad(xb, 1, constant_values=False)
    if connectivity == 1:
        offs = ((0, 0), (-1, 0), (1, 0), (0, -1), (0, 1))       # cross
    else:
        offs = tuple((dy, dx) for dy in (-1, 0, 1) for dx in (-1, 0, 1))
    er = xb
    for dy, dx in offs:
        er = er & p[1 + dy:1 + dy + h, 1 + dx:1 + dx + w]
    return xb & (~er)


def _pack_points(mask2d, sy, sx, npad):
    """Compact boundary pixels of mask2d into padded coordinate packs."""
    h, w = mask2d.shape
    n = h * w
    flat = mask2d.reshape(-1)
    count = jnp.sum(flat.astype(jnp.int32))
    idx = jnp.nonzero(flat, size=n, fill_value=0)[0].astype(jnp.int32)   # (n,)
    idx = jnp.pad(idx, (0, npad - n))                                    # (npad,)
    valid = jnp.arange(npad, dtype=jnp.int32) < count
    validf = valid.astype(jnp.float32)

    ys = (idx // w).astype(jnp.float32) * jnp.float32(sy) * validf
    xs = (idx % w).astype(jnp.float32) * jnp.float32(sx) * validf
    norm = ys * ys + xs * xs

    # Query pack: (npad, 128) with lanes [y, x, |q|^2, valid, 0, ...].
    qd = jnp.zeros((npad, _LANES), jnp.float32)
    qd = qd.at[:, 0].set(ys).at[:, 1].set(xs)
    qd = qd.at[:, 2].set(norm).at[:, 3].set(validf)
    # Target coord pack: (128, npad) with rows [-2y, -2x, 0, ...].
    td = jnp.zeros((_LANES, npad), jnp.float32)
    td = td.at[0, :].set(-2.0 * ys).at[1, :].set(-2.0 * xs)
    # Target norms row; padded targets get +BIG so they never win the min.
    tn = (norm + jnp.where(valid, 0.0, jnp.float32(_BIG))).reshape(1, npad)
    return qd, td, tn, count


class SurfaceDistanceMeanLoss:
    """Mean Surface Distance (MSD) loss; mirrors the PyTorch module's forward."""

    def __init__(self, sampling=1, connectivity=1, precision='half'):
        self.sampling = sampling
        self.connectivity = connectivity
        self.precision = precision

    def __call__(self, pred, gt):
        # TODO(synk): 3-D volumes (3x3x3 connectivity) not implemented; 2-D masks only.
        assert pred.ndim == 2 and pred.shape == gt.shape
        h, w = pred.shape
        samp = self.sampling
        if isinstance(samp, (int, float)):
            sy = sx = float(samp)
        else:
            sy, sx = float(samp[0]), float(samp[1])

        s_mask = _boundary(pred, self.connectivity)    # S  (pred boundary)
        sp_mask = _boundary(gt, self.connectivity)     # S' (gt boundary)

        npad = _round_up(h * w, max(_TP, _TQ))
        qd_s, td_s, tn_s, cnt_s = _pack_points(s_mask, sy, sx, npad)
        qd_sp, td_sp, tn_sp, cnt_sp = _pack_points(sp_mask, sy, sx, npad)

        # sum_{p in S'} d(p, S)   == sum(dta[S' != 0])
        sum_a = _directed_chamfer_sum(qd_sp, cnt_sp, td_s, tn_s, cnt_s)
        # sum_{p in S}  d(p, S')  == sum(dtb[S != 0])
        sum_b = _directed_chamfer_sum(qd_s, cnt_s, td_sp, tn_sp, cnt_sp)

        den = (cnt_s + cnt_sp).astype(jnp.float32)
        # Guard the fully-degenerate case (both boundary sets empty) that would
        # otherwise produce NaN/Inf (numpy reference: mean of an empty array).
        sdm = jnp.where(den > 0, (sum_a + sum_b) / den, jnp.float32(0.0))
        if self.precision == 'half':
            sdm = sdm.astype(jnp.float16)
        return sdm


# --------------------------------------------------------------------------
# Pure-JAX reference (same math, no Pallas) for a sanity check.
# --------------------------------------------------------------------------
def _reference(pred, gt, sampling=1.0, connectivity=1):
    s = _boundary(pred, connectivity).reshape(-1)
    sp = _boundary(gt, connectivity).reshape(-1)
    h, w = pred.shape
    ys, xs = jnp.meshgrid(jnp.arange(h), jnp.arange(w), indexing='ij')
    coords = jnp.stack([ys.reshape(-1), xs.reshape(-1)], -1).astype(jnp.float32)
    coords = coords * jnp.float32(sampling)
    d = jnp.sqrt(jnp.sum((coords[:, None, :] - coords[None, :, :]) ** 2, -1))
    big = jnp.float32(1e30)
    d_to_s = jnp.min(jnp.where(s[None, :], d, big), axis=1)
    d_to_sp = jnp.min(jnp.where(sp[None, :], d, big), axis=1)
    num = jnp.sum(jnp.where(sp, d_to_s, 0.0)) + jnp.sum(jnp.where(s, d_to_sp, 0.0))
    den = jnp.sum(s.astype(jnp.float32)) + jnp.sum(sp.astype(jnp.float32))
    return num / den


if __name__ == "__main__":
    key = jax.random.PRNGKey(0)
    k1, k2 = jax.random.split(key)
    H, W = 16, 16
    # Deterministic synthetic binary segmentations (no parameters in this module).
    pred = (jax.random.uniform(k1, (H, W)) > 0.6).astype(jnp.float32)
    gt = (jax.random.uniform(k2, (H, W)) > 0.5).astype(jnp.float32)

    loss_fn = SurfaceDistanceMeanLoss(sampling=1, connectivity=1, precision='half')
    out = loss_fn(pred, gt)
    out = jax.block_until_ready(out)

    ref = _reference(pred, gt, 1.0, 1)
    assert out.dtype == jnp.float16
    assert abs(float(out) - float(ref)) < 1e-2, (float(out), float(ref))
    print("KERNEL_OK")
</pallas_src>

<mosaic_0001>
module attributes {stable_mosaic.version = 11 : i64} {
  func.func @_chamfer_kernel(%arg0: i32, %arg1: i32, %arg2: memref<2xi32, #tpu.memory_space<smem>>, %arg3: memref<256x128xf32, #tpu.memory_space<vmem>>, %arg4: memref<128x512xf32, #tpu.memory_space<vmem>>, %arg5: memref<1x512xf32, #tpu.memory_space<vmem>>, %arg6: memref<1x128xf32, #tpu.memory_space<vmem>>, %arg7: memref<256x128xf32, #tpu.memory_space<vmem>>) attributes {dimension_semantics = [#tpu.dimension_semantics<parallel>, #tpu.dimension_semantics<arbitrary>], iteration_bounds = array<i64: 2, 1>, scalar_prefetch = 1 : i64, scratch_operands = 1 : i64, tpu.core_type = #tpu.core_type<tc>, window_params = [{transform_indices = @transform_0, window_bounds = array<i64: 256, 128>}, {transform_indices = @transform_1, window_bounds = array<i64: 128, 512>}, {transform_indices = @transform_2, window_bounds = array<i64: 1, 512>}, {transform_indices = @transform_3, window_bounds = array<i64: 1, 128>}]} {
    %c0 = arith.constant 0 : index
    %0 = memref.load %arg2[%c0] : memref<2xi32, #tpu.memory_space<smem>>
    %c1 = arith.constant 1 : index
    %1 = memref.load %arg2[%c1] : memref<2xi32, #tpu.memory_space<smem>>
    %c0_i32 = arith.constant 0 : i32
    %2 = arith.cmpi eq, %arg1, %c0_i32 : i32
    %3 = arith.extui %2 : i1 to i32
    %c0_i32_0 = arith.constant 0 : i32
    %4 = arith.cmpi ne, %3, %c0_i32_0 : i32
    scf.if %4 {
      %cst = arith.constant 1.000000e+30 : f32
      %15 = vector.broadcast %cst : f32 to vector<256x128xf32>
      %c0_4 = arith.constant 0 : index
      %c0_5 = arith.constant 0 : index
      %16 = vector.load %arg7[%c0_4, %c0_5] : memref<256x128xf32, #tpu.memory_space<vmem>>, vector<256x128xf32>
      tpu.vector_store %arg7[%c0_4, %c0_5], %15 {strides = array<i32>} : memref<256x128xf32, #tpu.memory_space<vmem>>, vector<256x128xf32>,
    } else {
    }
    %c256_i32 = arith.constant 256 : i32
    %5 = arith.muli %arg0, %c256_i32 : i32
    %6 = arith.cmpi slt, %5, %0 : i32
    %c512_i32 = arith.constant 512 : i32
    %7 = arith.muli %arg1, %c512_i32 : i32
    %8 = arith.cmpi slt, %7, %1 : i32
    %9 = arith.andi %6, %8 : i1
    %10 = arith.extui %9 : i1 to i32
    %c0_i32_1 = arith.constant 0 : i32
    %11 = arith.cmpi ne, %10, %c0_i32_1 : i32
    scf.if %11 {
      %c0_4 = arith.constant 0 : index
      %c0_5 = arith.constant 0 : index
      %15 = vector.load %arg3[%c0_4, %c0_5] : memref<256x128xf32, #tpu.memory_space<vmem>>, vector<256x128xf32>
      %c0_6 = arith.constant 0 : index
      %c0_7 = arith.constant 0 : index
      %16 = vector.load %arg4[%c0_6, %c0_7] : memref<128x512xf32, #tpu.memory_space<vmem>>, vector<128x512xf32>
      %cst = arith.constant dense<0.000000e+00> : vector<256x512xf32>
      %17 = tpu.matmul %15, %16, %cst {dimension_numbers = #tpu.dot_dimension_numbers<[1], [0], [0], [1], [0, 0, 1, 1], [], []>} : vector<256x128xf32>, vector<128x512xf32>, vector<256x512xf32> -> vector<256x512xf32>
      %18 = vector.extract_strided_slice %15 {offsets = [0, 2], sizes = [256, 1], strides = [1, 1]} : vector<256x128xf32> to vector<256x1xf32>
      %19 = vector.broadcast %18 : vector<256x1xf32> to vector<256x512xf32>
      %20 = arith.addf %17, %19 : vector<256x512xf32>
      %c0_8 = arith.constant 0 : index
      %c0_9 = arith.constant 0 : index
      %21 = vector.load %arg5[%c0_8, %c0_9] : memref<1x512xf32, #tpu.memory_space<vmem>>, vector<1x512xf32>
      %22 = vector.broadcast %21 : vector<1x512xf32> to vector<256x512xf32>
      %23 = arith.addf %20, %22 : vector<256x512xf32>
      %c0_10 = arith.constant 0 : index
      %c0_11 = arith.constant 0 : index
      %24 = vector.load %arg7[%c0_10, %c0_11] : memref<256x128xf32, #tpu.memory_space<vmem>>, vector<256x128xf32>
      %25 = vector.extract_strided_slice %23 {offsets = [0, 0], sizes = [256, 128], strides = [1, 1]} : vector<256x512xf32> to vector<256x128xf32>
      %26 = arith.minimumf %24, %25 : vector<256x128xf32>
      %27 = vector.extract_strided_slice %23 {offsets = [0, 128], sizes = [256, 128], strides = [1, 1]} : vector<256x512xf32> to vector<256x128xf32>
      %28 = arith.minimumf %26, %27 : vector<256x128xf32>
      %29 = vector.extract_strided_slice %23 {offsets = [0, 256], sizes = [256, 128], strides = [1, 1]} : vector<256x512xf32> to vector<256x128xf32>
      %30 = arith.minimumf %28, %29 : vector<256x128xf32>
      %31 = vector.extract_strided_slice %23 {offsets = [0, 384], sizes = [256, 128], strides = [1, 1]} : vector<256x512xf32> to vector<256x128xf32>
      %32 = arith.minimumf %30, %31 : vector<256x128xf32>
      %c0_12 = arith.constant 0 : index
      %c0_13 = arith.constant 0 : index
      %33 = vector.load %arg7[%c0_12, %c0_13] : memref<256x128xf32, #tpu.memory_space<vmem>>, vector<256x128xf32>
      tpu.vector_store %arg7[%c0_12, %c0_13], %32 {strides = array<i32>} : memref<256x128xf32, #tpu.memory_space<vmem>>, vector<256x128xf32>,
    } else {
    }
    %c0_i32_2 = arith.constant 0 : i32
    %12 = arith.cmpi eq, %arg1, %c0_i32_2 : i32
    %13 = arith.extui %12 : i1 to i32
    %c0_i32_3 = arith.constant 0 : i32
    %14 = arith.cmpi ne, %13, %c0_i32_3 : i32
    scf.if %14 {
      %c0_4 = arith.constant 0 : index
      %c0_5 = arith.constant 0 : index
      %15 = vector.load %arg7[%c0_4, %c0_5] : memref<256x128xf32, #tpu.memory_space<vmem>>, vector<256x128xf32>
      %cst = arith.constant dense<0x7F800000> : vector<256xf32>
      %16 = vector.multi_reduction <minimumf>, %15, %cst [1] : vector<256x128xf32> to vector<256xf32>
      %17 = vector.shape_cast %16 : vector<256xf32> to vector<256x1xf32>
      %cst_6 = arith.constant 0.000000e+00 : f32
      %18 = vector.broadcast %cst_6 : f32 to vector<256x1xf32>
      %19 = arith.maximumf %17, %18 : vector<256x1xf32>
      %20 = math.sqrt %19 : vector<256x1xf32>
      %c0_7 = arith.constant 0 : index
      %c3 = arith.constant 3 : index
      %21 = vector.load %arg3[%c0_7, %c3] : memref<256x128xf32, #tpu.memory_space<vmem>>, vector<256x1xf32>
      %22 = arith.mulf %20, %21 : vector<256x1xf32>
      %23 = vector.shape_cast %22 : vector<256x1xf32> to vector<1x256x1xf32>
      %cst_8 = arith.constant dense<0.000000e+00> : vector<1xf32>
      %24 = vector.multi_reduction <add>, %23, %cst_8 [1, 2] : vector<1x256x1xf32> to vector<1xf32>
      %25 = vector.shape_cast %24 : vector<1xf32> to vector<1x1x1xf32>
      %26 = vector.extract %25[0, 0, 0] : f32 from vector<1x1x1xf32>
      %27 = vector.broadcast %26 : f32 to vector<1x1xf32>
      %28 = tpu.iota {dimensions = array<i32: 1>} : vector<1x128xi32>
      %c0_i32_9 = arith.constant 0 : i32
      %29 = vector.broadcast %c0_i32_9 : i32 to vector<1x128xi32>
      %30 = arith.cmpi eq, %28, %29 : vector<1x128xi32>
      %cst_10 = arith.constant 0.000000e+00 : f32
      %31 = vector.shape_cast %27 : vector<1x1xf32> to vector<1x1xf32>
      %32 = vector.broadcast %31 : vector<1x1xf32> to vector<1x128xf32>
      %33 = vector.broadcast %cst_10 : f32 to vector<1x128xf32>
      %34 = arith.select %30, %32, %33 : vector<1x128xi1>, vector<1x128xf32>
      %c0_11 = arith.constant 0 : index
      %c0_12 = arith.constant 0 : index
      %35 = vector.load %arg6[%c0_11, %c0_12] : memref<1x128xf32, #tpu.memory_space<vmem>>, vector<1x128xf32>
      tpu.vector_store %arg6[%c0_11, %c0_12], %34 {strides = array<i32>} : memref<1x128xf32, #tpu.memory_space<vmem>>, vector<1x128xf32>,
    } else {
    }
    return
  }
  func.func @transform_0(%arg0: i32, %arg1: i32, %arg2: memref<2xi32, #tpu.memory_space<smem>>) -> (i32, i32) {
    %c0_i32 = arith.constant 0 : i32
    %c0_i32_0 = arith.constant 0 : i32
    return %arg0, %c0_i32 : i32, i32
  }
  func.func @transform_1(%arg0: i32, %arg1: i32, %arg2: memref<2xi32, #tpu.memory_space<smem>>) -> (i32, i32) {
    %c0_i32 = arith.constant 0 : i32
    %c0_i32_0 = arith.constant 0 : i32
    return %c0_i32, %arg1 : i32, i32
  }
  func.func @transform_2(%arg0: i32, %arg1: i32, %arg2: memref<2xi32, #tpu.memory_space<smem>>) -> (i32, i32) {
    %c0_i32 = arith.constant 0 : i32
    %c0_i32_0 = arith.constant 0 : i32
    return %c0_i32, %arg1 : i32, i32
  }
  func.func @transform_3(%arg0: i32, %arg1: i32, %arg2: memref<2xi32, #tpu.memory_space<smem>>) -> (i32, i32) {
    %c0_i32 = arith.constant 0 : i32
    %c0_i32_0 = arith.constant 0 : i32
    return %c0_i32, %arg0 : i32, i32
  }
}

</mosaic_0001>

<bundles_post_ra>
// kernel: tpu_custom_call.1
= control target key start
LH: loop header
LB: loop body
LE: loop exit
PB: predicated region body
PF: predicated region fallthrough
CT: control target
= control target key end

     0   :  { %s3561_s0 = inlined_call_operand.hbm [shape: s32[2], index: 0, kind: input, shape index: {}]   ;;  %s3562_s1 = inlined_call_operand.hbm [shape: f32[512,128], index: 1, kind: input, shape index: {}]   ;;  %s3563_s2 = inlined_call_operand.hbm [shape: f32[128,512], index: 2, kind: input, shape index: {}]   ;;  %s3564_s3 = inlined_call_operand.vmem [shape: f32[1,512], index: 3, kind: input, shape index: {}]   ;;  %s3565_s4 = inlined_call_operand.hbm [shape: f32[1,256], index: 4, kind: output, shape index: {}]  }
   0x1   :  { %s2377_s17 = scalar_lea.hbm %s3561_s0, 16 }
   0x2   :  { %p2378_p0 = scmp.ne.s32.totalorder %s3561_s0, %s2377_s17  ;;  %p2381_p1 = scmp.lt.u32.totalorder %s2377_s17, %s3561_s0 }
   0x4   :  { %p2383_p2 = pnand %p2381_p1, %p2378_p0 }
   0x6   :  { %2386 = shalt.err (!%p2383_p2)  }
   0x7   :  { %s2535_s22 = smov [#allocation4]  }
   0x8   :  { %10 = dma.hbm_to_smem %s3561_s0, 16, %s2535_s22, [#allocation3] }
   0x9   :  { %2497 = dma.done.wait [#allocation3], 16 }
   0xa   :  { %2498 = vsyncadd [#allocation3], 4294967280 }
   0xb   :  { %12 = sfence }
   0xc   :  { %13 = vsyncpa [#allocation6], 0 }
   0xd   :  { %15 = vsyncpa [#allocation6 + $0x1], 0 }
   0xe   :  { %16 = vsyncpa [#allocation9], 0 }
   0xf   :  { %17 = vsyncpa [#allocation7], 0 }
  0x10   :  { %19 = vsyncpa [#allocation7 + $0x1], 0  ;;  %s2584_s25 = smov 0   ;;  %s2586_s26 = smov 0  }
  0x11   :  { %s2588_s27 = smov 0   ;;  %s2590_s28 = smov 0  }
  0x12   :  { %s2592_s29 = smov 0   ;;  %s2594_s30 = smov 0  }
  0x13 LB: > { %s2144_s0 = sadd.s32 4294967295, %s2533_s30   ;;  %s2145_s5 = sadd.s32 4294967294, %s2533_s30   ;;  %s2533_s30 = sphi %s2594_s30, %s25_s30   ;;  %s2529_s29 = sphi %s2592_s29, %s3589_s29   ;;  %s2525_s28 = sphi %s2590_s28, %s3588_s28   ;;  %s2521_s27 = sphi %s2588_s27, %s3587_s27   ;;  %s2517_s26 = sphi %s2586_s26, %s3586_s26   ;;  %s2513_s25 = sphi %s2584_s25, %s3585_s25  }
  0x14   : > { %p57_p3 = scmp.ne.s32.totalorder %s2517_s26, %s2513_s25  ;;  %p2618_p4 = scmp.eq.s32.totalorder %s2144_s0, 0 }
  0x15   : > { %p2622_p5 = scmp.eq.s32.totalorder %s2144_s0, 1  ;;  %p139_p6 = scmp.eq.s32.totalorder %s2145_s5, 1 }
  0x16   : > { %s3570_s6 = scalar_select %p2618_p4, 1, 0 }
  0x17   : > { %s3571_s7 = scalar_select %p2622_p5, 1, 0 }
  0x18   : > { %p2628_p7 = por %p2618_p4, %p57_p3  ;;  %p2146_p8 = scmp.ge.s32.totalorder %s2533_s30, 1 }
  0x19   : > { %p2633_p9 = por %p139_p6, %p57_p3  ;;  %p146_p10 = scmp.lt.s32.totalorder %s2533_s30, 3 }
  0x1a   : > { %s3572_s8 = scalar_select %p2628_p7, 1, 0 }
  0x1b   : > { %s3573_s9 = scalar_select %p2633_p9, 1, 0 }
  0x1c   : > { %p2638_p11 = pnand %p2146_p8, %p146_p10  ;;  %s2536_s11 = smov [#allocation8]  }
  0x1d   : > { %s161_s12 = sshll.u32 %s2536_s11, 4  ;;  %s37_s14 = sadd.s32 1, %s2529_s29  ;;  %s162_s12 = int_to_ptr.vmem [resolvable:$true] %s161_s12 }
  0x1e   : > { %s3574_s10 = scalar_select %p2638_p11, 1, 0 }
  0x1f   : > { %p2237_p12 = pneg %p2638_p11  ;;  %s2387_s17 = scalar_lea.hbm %s3563_s2, 8192 }
  0x20   : > { %p2388_p1 = scmp.ne.s32.totalorder %s3563_s2, %s2387_s17  ;;  %p2394_p8 = scmp.lt.u32.totalorder %s2387_s17, %s3563_s2 }
  0x21   : > { %p2647_p0 = pnand %p2237_p12, %p2618_p4 }
  0x23   : > { %p2389_p2 = pneg %p2647_p0 }
  0x25   : > { %p2390_p3 = pnand %p2389_p2, %p2388_p1 }
  0x27   : > { %p2391_p6 = pneg %p2390_p3 }
  0x29   : > { %p2396_p10 = pnand %p2394_p8, %p2391_p6 }
  0x2b   : > { %2399 = shalt.err (!%p2396_p10)
}
  0x2c   : > { %s2400_s22 = scalar_lea.vmem %s162_s12, 8192  ;;  %p2408_p4 = scmp.lt.s32.totalorder %s162_s12, %s162_s12 }
  0x2d   : > { %p2401_p12 = scmp.ne.s32.totalorder %s162_s12, %s2400_s22  ;;  %p2409_p7 = scmp.lt.s32.totalorder %s2400_s22, %s2400_s22 }
  0x2f   : > { %p2403_p13 = pnand %p2401_p12, %p2389_p2  ;;  %p2410_p11 = por %p2409_p7, %p2408_p4 }
  0x31   : > { %p2404_p9 = pneg %p2403_p13 }
  0x33   : > { %p2411_p5 = pnand %p2410_p11, %p2404_p9 }
  0x35   : > { %2414 = shalt.err (!%p2411_p5)
}
  0x36   : > { %s2537_s23 = smov 512   ;;  %s2538_s24 = smov 32  }
  0x37   : > { %2240 = dma.hbm_to_vmem [thread:$0]  (!%p2647_p0), %s3563_s2, 8192, %s162_s12, [#allocation9], %s2537_s23, %s2537_s23, %s2538_s24  }
  0x38   : > { %p39_p4 = scmp.ge.s32.totalorder %s37_s14, 2  ;;  %s44_s11 = sadd.s32 1, %s2521_s27 }
  0x39   : > { %p51_p5 = scmp.ne.s32.totalorder %s2521_s27, %s2517_s26  ;;  %p52_p7 = scmp.eq.s32.totalorder %s2533_s30, 0 }
  0x3a   : > { %s3591_s14 = smov (%p39_p4, %s37_s14), 0  ;;  %p3577_p11 = scmp.ne.s32.totalorder %s3571_s7, 0 }
  0x3b   : > { %p2674_p9 = por %p52_p7, %p51_p5  ;;  %s41_s13 = ssub.s32 %s2529_s29, %s3591_s14 }
  0x3c   : > { %p2680_p13 = por %p3577_p11, %p51_p5  ;;  %p2250_p1 = scmp.lt.s32.totalorder %s2533_s30, 2 }
  0x3d   : > { %p42_p0 = scmp.eq.s32.totalorder %s41_s13, 0  ;;  %s183_s12 = sand.u32 1, %s2521_s27  }
  0x3e   : > { %s2150_s17 = sshll.u32 %s183_s12, 8  ;;  %s2162_s19 = sshll.u32 %s2529_s29, 12 }
  0x3f   : > { %s2689_s18 = scalar_select %p42_p0, %s2521_s27, %s44_s11  }
  0x40   : > { %s2695_s22 = scalar_lea.hbm %s3562_s1, %s2162_s19  ;;  %s187_s7 = scalar_lea.vmem [#allocation5], %s2150_s17 }
  0x41   : > { %s194_s23 = sshll.u32 %s187_s7, 4  ;;  %p2701_p2 = pnand %p2250_p1, %p2674_p9  ;;  %s2697_s23 = int_to_ptr.vmem [resolvable:$true] %s194_s23 }
  0x42   : > { %s2705_s0 = scalar_lea.sflag [#allocation6], %s183_s12  ;;  %s2415_s5 = scalar_lea.hbm %s2695_s22, 4096 }
  0x43   : > { %p2416_p3 = scmp.ne.s32.totalorder %s2695_s22, %s2415_s5  ;;  %p2417_p6 = pneg %p2701_p2 }
  0x44   : > { %s2420_s15 = scalar_lea.hbm %s3562_s1, 8192  ;;  %p2421_p12 = scmp.lt.u32.totalorder %s2695_s22, %s3562_s1 }
  0x45   : > { %p2418_p8 = pnand %p2417_p6, %p2416_p3  ;;  %p2422_p4 = scmp.lt.u32.totalorder %s2420_s15, %s2415_s5 }
  0x46   : > { %p2424_p7 = scmp.lt.u32.totalorder %s2415_s5, %s2695_s22 }
  0x47   : > { %p2419_p10 = pneg %p2418_p8  ;;  %p2423_p5 = por %p2422_p4, %p2421_p12 }
  0x49   : > { %p2425_p9 = por %p2424_p7, %p2423_p5 }
  0x4b   : > { %p2426_p11 = pnand %p2425_p9, %p2419_p10 }
  0x4d   : > { %2429 = shalt.err (!%p2426_p11)
}
  0x4e   : > { %s2430_s12 = scalar_lea.vmem %s2697_s23, 4096  ;;  %s2539_s20 = smov [#allocation5]  }
  0x4f   : > { %p2431_p1 = scmp.ne.s32.totalorder %s2697_s23, %s2430_s12  ;;  %s2435_s21 = sshll.u32 %s2539_s20, 4  ;;  %s2436_s21 = int_to_ptr.vmem [resolvable:$false] %s2435_s21 }
  0x50   : > { %s2437_s7 = scalar_lea.vmem %s2436_s21, 8192  ;;  %p2438_p8 = scmp.lt.s32.totalorder %s2697_s23, %s2436_s21 }
  0x51   : > { %p2433_p0 = pnand %p2431_p1, %p2417_p6  ;;  %p2439_p12 = scmp.lt.s32.totalorder %s2437_s7, %s2430_s12 }
  0x53   : > { %p2434_p3 = pneg %p2433_p0  ;;  %p2440_p4 = por %p2439_p12, %p2438_p8 }
  0x55   : > { %p2441_p5 = pnand %p2440_p4, %p2434_p3 }
  0x57   : > { %2444 = shalt.err (!%p2441_p5)
}
  0x58   : > { %s2540_s5 = smov 128   ;;  %s2541_s11 = smov 8  }
  0x59   : > { %2244 = dma.hbm_to_vmem [thread:$0]  (!%p2701_p2), %s2695_s22, 4096, %s2697_s23, %s2705_s0, %s2540_s5, %s2540_s5, %s2541_s11  }
  0x5a   : > { %p3580_p6 = scmp.ne.s32.totalorder %s3574_s10, 0 }
  0x5b   : > { %s2736_s13 = sand.u32 (!%p3580_p6), 1, %s2517_s26   ;;  %p3581_p10 = scmp.ne.s32.totalorder (!%p3580_p6), %s3572_s8, 0 }
  0x5c   : > { %206 = sbr.rel (%p3580_p6) target bundleno = 1067 (0x42b), region = 32  ;;  %s2154_s15 = sshll.u32 (!%p3580_p6), %s2736_s13, 8 }
  0x5d   : > { %s209_s17 = scalar_lea.sflag (!%p3580_p6), [#allocation6], %s2736_s13  ;;  %s2740_s19 = scalar_lea.vmem (!%p3580_p6), [#allocation5], %s2154_s15 }
  0x63   : > { %2500 = dma.done.wait (%p3581_p10), %s209_s17, 4096  }
  0x64   : > { %2502 = vsyncadd (%p3581_p10), %s209_s17, 4294963200  ;;  %p3582_p2 = scmp.ne.s32.totalorder %s3570_s6, 0 }
  0x66   : > { %2504 = dma.done.wait (%p3582_p2), [#allocation9], 8192  }
  0x67   : > { %2506 = vsyncadd (%p3582_p2), [#allocation9], 4294959104  ;;  %s2750_s10 = sld [smem:[#allocation4]]  ;;  %s2752_s22 = sld [smem:[#allocation4 + $0x1]]  ;;  %v2542_v0 = vmov 1e+30  }
  0x68   : > { %255 = vst [vmem:[#allocation2] sm:$0xff] %v2542_v0  ;;  %256 = vst [vmem:[#allocation2 + $0x8] sm:$0xff] %v2542_v0  ;;  %s2157_s6 = sshll.u32 %s2525_s28, 8  ;;  %s241_s8 = scalar_lea.vmem [#allocation10], %s2736_s13 }
  0x69   : > { %257 = vst [vmem:[#allocation2 + $0x10] sm:$0xff] %v2542_v0  ;;  %258 = vst [vmem:[#allocation2 + $0x18] sm:$0xff] %v2542_v0 }
  0x6a   : > { %259 = vst [vmem:[#allocation2 + $0x20] sm:$0xff] %v2542_v0  ;;  %260 = vst [vmem:[#allocation2 + $0x28] sm:$0xff] %v2542_v0 }
  0x6b   : > { %261 = vst [vmem:[#allocation2 + $0x30] sm:$0xff] %v2542_v0  ;;  %262 = vst [vmem:[#allocation2 + $0x38] sm:$0xff] %v2542_v0 }
  0x6c   : > { %263 = vst [vmem:[#allocation2 + $0x40] sm:$0xff] %v2542_v0  ;;  %264 = vst [vmem:[#allocation2 + $0x48] sm:$0xff] %v2542_v0 }
  0x6d   : > { %265 = vst [vmem:[#allocation2 + $0x50] sm:$0xff] %v2542_v0  ;;  %266 = vst [vmem:[#allocation2 + $0x58] sm:$0xff] %v2542_v0  ;;  %p288_p7 = scmp.lt.s32.totalorder %s2157_s6, %s2750_s10  ;;  %p2158_p9 = scmp.gt.s32.totalorder %s2752_s22, 0 }
  0x6e   : > { %267 = vst [vmem:[#allocation2 + $0x60] sm:$0xff] %v2542_v0  ;;  %268 = vst [vmem:[#allocation2 + $0x68] sm:$0xff] %v2542_v0 }
  0x6f   : > { %269 = vst [vmem:[#allocation2 + $0x70] sm:$0xff] %v2542_v0  ;;  %270 = vst [vmem:[#allocation2 + $0x78] sm:$0xff] %v2542_v0  ;;  %p291_p11 = pnand %p2158_p9, %p288_p7 }
  0x70   : > { %271 = vst [vmem:[#allocation2 + $0x80] sm:$0xff] %v2542_v0  ;;  %272 = vst [vmem:[#allocation2 + $0x88] sm:$0xff] %v2542_v0  ;;  %v328_v1 = vld [vmem:[#allocation8 + $0x8] sm:$0xff] (!%p291_p11)  ;;  %v330_v3 = vld [vmem:[#allocation8 + $0x18] sm:$0xff] (!%p291_p11)  ;;  %v2543_v8 = vmov (!%p291_p11), 0.0   ;;  %v2544_v14 = vmov (!%p291_p11), 2  }
  0x71   : > { %273 = vst [vmem:[#allocation2 + $0x90] sm:$0xff] %v2542_v0  ;;  %274 = vst [vmem:[#allocation2 + $0x98] sm:$0xff] %v2542_v0  ;;  %294 = sbr.rel (%p291_p11) target bundleno = 498 (0x1f2), region = 48  ;;  %v332_v2 = vld [vmem:[#allocation8 + $0x28] sm:$0xff] (!%p291_p11)  ;;  %v334_v5 = vld [vmem:[#allocation8 + $0x38] sm:$0xff] (!%p291_p11)  ;;  %615 = vmatprep.mubr.f32.mxu0 (!%p291_p11), %v2543_v8  ;;  %872 = vmatprep.mubr.f32.mxu1 (!%p291_p11), %v2543_v8 }
  0x72   : > { %275 = vst [vmem:[#allocation2 + $0xa0] sm:$0xff] %v2542_v0  ;;  %276 = vst [vmem:[#allocation2 + $0xa8] sm:$0xff] %v2542_v0  ;;  %v2163_v4 = vpack.c.bf16 (!%p291_p11), %v332_v2, %v328_v1  ;;  %v327_v6 = vld [vmem:[#allocation8] sm:$0xff] (!%p291_p11)  ;;  %v2195_v9 = vpack.c.bf16 (!%p291_p11), %v334_v5, %v330_v3  ;;  %v329_v11 = vld [vmem:[#allocation8 + $0x10] sm:$0xff] (!%p291_p11)  ;;  %2311 = vset.pattern.permute.xlu0 (!%p291_p11), %v2544_v14  ;;  %2312 = vset.pattern.permute.xlu1 (!%p291_p11), %v2544_v14 }
  0x73   : > { %277 = vst [vmem:[#allocation2 + $0xb0] sm:$0xff] %v2542_v0  ;;  %278 = vst [vmem:[#allocation2 + $0xb8] sm:$0xff] %v2542_v0  ;;  %v331_v7 = vld [vmem:[#allocation8 + $0x20] sm:$0xff] (!%p291_p11)  ;;  %v333_v12 = vld [vmem:[#allocation8 + $0x30] sm:$0xff] (!%p291_p11) }
  0x74   : > { %279 = vst [vmem:[#allocation2 + $0xc0] sm:$0xff] %v2542_v0  ;;  %280 = vst [vmem:[#allocation2 + $0xc8] sm:$0xff] %v2542_v0  ;;  %v2165_v10 = vpack.c.bf16 (!%p291_p11), %v331_v7, %v327_v6  ;;  %v336_v13 = vld [vmem:[#allocation8 + $0x48] sm:$0xff] (!%p291_p11)  ;;  %2164 = vmatprep.subr.bf16.mxu0 (!%p291_p11), %v2163_v4  ;;  %v2197_v15 = vpack.c.bf16 (!%p291_p11), %v333_v12, %v329_v11  ;;  %v338_v17 = vld [vmem:[#allocation8 + $0x58] sm:$0xff] (!%p291_p11)  ;;  %2196 = vmatprep.subr.bf16.mxu1 (!%p291_p11), %v2195_v9 }
  0x75   : > { %281 = vst [vmem:[#allocation2 + $0xd0] sm:$0xff] %v2542_v0  ;;  %282 = vst [vmem:[#allocation2 + $0xd8] sm:$0xff] %v2542_v0  ;;  %v340_v16 = vld [vmem:[#allocation8 + $0x68] sm:$0xff] (!%p291_p11)  ;;  %v342_v18 = vld [vmem:[#allocation8 + $0x78] sm:$0xff] (!%p291_p11) }
  0x76   : > { %283 = vst [vmem:[#allocation2 + $0xe0] sm:$0xff] %v2542_v0  ;;  %284 = vst [vmem:[#allocation2 + $0xe8] sm:$0xff] %v2542_v0  ;;  %2166 = vmatpush1.bf16.msra.mxu0 (!%p291_p11), %v2165_v10  ;;  %v2167_v19 = vpack.c.bf16 (!%p291_p11), %v340_v16, %v336_v13  ;;  %v2199_v20 = vpack.c.bf16 (!%p291_p11), %v342_v18, %v338_v17  ;;  %v335_v21 = vld [vmem:[#allocation8 + $0x40] sm:$0xff] (!%p291_p11)  ;;  %v337_v23 = vld [vmem:[#allocation8 + $0x50] sm:$0xff] (!%p291_p11)  ;;  %2198 = vmatpush1.bf16.msra.mxu1 (!%p291_p11), %v2197_v15 }
  0x77   : > { %285 = vst [vmem:[#allocation2 + $0xf0] sm:$0xff] %v2542_v0  ;;  %286 = vst [vmem:[#allocation2 + $0xf8] sm:$0xff] %v2542_v0  ;;  %v339_v22 = vld [vmem:[#allocation8 + $0x60] sm:$0xff] (!%p291_p11)  ;;  %v341_v25 = vld [vmem:[#allocation8 + $0x70] sm:$0xff] (!%p291_p11) }
  0x78   : > { %v2169_v24 = vpack.c.bf16 %v339_v22, %v335_v21  ;;  %v344_v26 = vld [vmem:[#allocation8 + $0x88] sm:$0xff]  ;;  %2168 = vmatprep.subr.bf16.mxu0 %v2167_v19  ;;  %2200 = vmatprep.subr.bf16.mxu1 %v2199_v20  ;;  %v2201_v28 = vpack.c.bf16 %v341_v25, %v337_v23  ;;  %v346_v30 = vld [vmem:[#allocation8 + $0x98] sm:$0xff]  ;;  %v343_v32 = vld [vmem:[#allocation8 + $0x80] sm:$0xff] }
  0x79   : > { %v348_v27 = vld [vmem:[#allocation8 + $0xa8] sm:$0xff]  ;;  %v350_v31 = vld [vmem:[#allocation8 + $0xb8] sm:$0xff]  ;;  %v347_v34 = vld [vmem:[#allocation8 + $0xa0] sm:$0xff] }
  0x7a   : > { %v2171_v29 = vpack.c.bf16 %v348_v27, %v344_v26  ;;  %v2203_v33 = vpack.c.bf16 %v350_v31, %v346_v30  ;;  %v345_v35 = vld [vmem:[#allocation8 + $0x90] sm:$0xff]  ;;  %2170 = vmatpush1.bf16.msra.mxu0 %v2169_v24  ;;  %v2173_v37 = vpack.c.bf16 %v347_v34, %v343_v32  ;;  %v352_v38 = vld [vmem:[#allocation8 + $0xc8] sm:$0xff]  ;;  %v354_v40 = vld [vmem:[#allocation8 + $0xd8] sm:$0xff]  ;;  %2202 = vmatpush1.bf16.msra.mxu1 %v2201_v28 }
  0x7b   : > { %v349_v36 = vld [vmem:[#allocation8 + $0xb0] sm:$0xff]  ;;  %v356_v39 = vld [vmem:[#allocation8 + $0xe8] sm:$0xff]  ;;  %v358_v43 = vld [vmem:[#allocation8 + $0xf8] sm:$0xff] }
  0x7c   : > { %2172 = vmatprep.subr.bf16.mxu0 %v2171_v29  ;;  %v2205_v41 = vpack.c.bf16 %v349_v36, %v345_v35  ;;  %v2175_v42 = vpack.c.bf16 %v356_v39, %v352_v38  ;;  %v351_v44 = vld [vmem:[#allocation8 + $0xc0] sm:$0xff]  ;;  %2204 = vmatprep.subr.bf16.mxu1 %v2203_v33  ;;  %v2207_v46 = vpack.c.bf16 %v358_v43, %v354_v40  ;;  %v353_v47 = vld [vmem:[#allocation8 + $0xd0] sm:$0xff]  ;;  %v360_v49 = vld [vmem:[#allocation8 + $0x108] sm:$0xff] }
  0x7d   : > { %v355_v45 = vld [vmem:[#allocation8 + $0xe0] sm:$0xff]  ;;  %v357_v48 = vld [vmem:[#allocation8 + $0xf0] sm:$0xff]  ;;  %v364_v50 = vld [vmem:[#allocation8 + $0x128] sm:$0xff] }
  0x7e   : > { %v362_v51 = vld [vmem:[#allocation8 + $0x118] sm:$0xff]  ;;  %2174 = vmatpush1.bf16.msra.mxu0 %v2173_v37  ;;  %v2177_v53 = vpack.c.bf16 %v355_v45, %v351_v44  ;;  %2206 = vmatpush1.bf16.msra.mxu1 %v2205_v41  ;;  %v2209_v54 = vpack.c.bf16 %v357_v48, %v353_v47  ;;  %v2179_v55 = vpack.c.bf16 %v364_v50, %v360_v49  ;;  %v359_v56 = vld [vmem:[#allocation8 + $0x100] sm:$0xff]  ;;  %v361_v58 = vld [vmem:[#allocation8 + $0x110] sm:$0xff] }
  0x7f   : > { %v366_v52 = vld [vmem:[#allocation8 + $0x138] sm:$0xff]  ;;  %2176 = vmatprep.subr.bf16.mxu0 %v2175_v42  ;;  %v363_v57 = vld [vmem:[#allocation8 + $0x120] sm:$0xff]  ;;  %2208 = vmatprep.subr.bf16.mxu1 %v2207_v46  ;;  %v365_v60 = vld [vmem:[#allocation8 + $0x130] sm:$0xff] }
  0x80   : > { %v2211_v59 = vpack.c.bf16 %v366_v52, %v362_v51  ;;  %v368_v61 = vld [vmem:[#allocation8 + $0x148] sm:$0xff]  ;;  %v370_v63 = vld [vmem:[#allocation8 + $0x158] sm:$0xff]  ;;  %v2181_v1 = vpack.c.bf16 %v363_v57, %v359_v56  ;;  %v2213_v2 = vpack.c.bf16 %v365_v60, %v361_v58  ;;  %v367_v4 = vld [vmem:[#allocation8 + $0x140] sm:$0xff] }
  0x81   : > { %v372_v62 = vld [vmem:[#allocation8 + $0x168] sm:$0xff]  ;;  %v374_v0 = vld [vmem:[#allocation8 + $0x178] sm:$0xff]  ;;  %v371_v5 = vld [vmem:[#allocation8 + $0x160] sm:$0xff] }
  0x82   : > { %2178 = vmatpush1.bf16.msra.mxu0 %v2177_v53  ;;  %2210 = vmatpush1.bf16.msra.mxu1 %v2209_v54  ;;  %v2183_v3 = vpack.c.bf16 %v372_v62, %v368_v61  ;;  %v369_v6 = vld [vmem:[#allocation8 + $0x150] sm:$0xff]  ;;  %v2215_v7 = vpack.c.bf16 %v374_v0, %v370_v63  ;;  %v376_v10 = vld [vmem:[#allocation8 + $0x188] sm:$0xff]  ;;  %v378_v12 = vld [vmem:[#allocation8 + $0x198] sm:$0xff]  ;;  %v2185_v14 = vpack.c.bf16 %v371_v5, %v367_v4  ;;  %v1067_v4 = vlaneseq }
  0x83   : > { %2180 = vmatprep.subr.bf16.mxu0 %v2179_v55  ;;  %2212 = vmatprep.subr.bf16.mxu1 %v2211_v59  ;;  %v373_v9 = vld [vmem:[#allocation8 + $0x170] sm:$0xff]  ;;  %v380_v11 = vld [vmem:[#allocation8 + $0x1a8] sm:$0xff]  ;;  %v382_v13 = vld [vmem:[#allocation8 + $0x1b8] sm:$0xff] }
  0x84   : > { %v375_v15 = vld [vmem:[#allocation8 + $0x180] sm:$0xff]  ;;  %v2217_v17 = vpack.c.bf16 %v373_v9, %v369_v6  ;;  %v2187_v18 = vpack.c.bf16 %v380_v11, %v376_v10  ;;  %v377_v19 = vld [vmem:[#allocation8 + $0x190] sm:$0xff]  ;;  %v2219_v22 = vpack.c.bf16 %v382_v13, %v378_v12  ;;  %v384_v23 = vld [vmem:[#allocation8 + $0x1c8] sm:$0xff]  ;;  %v1068_v5 = vshrl.u32 %v1067_v4, 7 }
  0x85   : > { %v379_v16 = vld [vmem:[#allocation8 + $0x1a0] sm:$0xff]  ;;  %v381_v20 = vld [vmem:[#allocation8 + $0x1b0] sm:$0xff]  ;;  %v388_v24 = vld [vmem:[#allocation8 + $0x1e8] sm:$0xff] }
  0x86   : > { %2182 = vmatpush1.bf16.msra.mxu0 %v2181_v1  ;;  %2214 = vmatpush1.bf16.msra.mxu1 %v2213_v2  ;;  %v295_v21 = vld [vmem:[%s2740_s19] sm:$0xff]  ;;  %v297_v25 = vld [vmem:[%s2740_s19 + $0x10] sm:$0xff]  ;;  %v386_v26 = vld [vmem:[#allocation8 + $0x1d8] sm:$0xff]  ;;  %v2189_v28 = vpack.c.bf16 %v379_v16, %v375_v15  ;;  %v2221_v29 = vpack.c.bf16 %v381_v20, %v377_v19  ;;  %v2191_v30 = vpack.c.bf16 %v388_v24, %v384_v23  ;;  %v1069_v6 = vsub.s32 0, %v1068_v5 }
  0x87   : > { %2184 = vmatprep.subr.bf16.mxu0 %v2183_v3  ;;  %2216 = vmatprep.subr.bf16.mxu1 %v2215_v7  ;;  %v390_v27 = vld [vmem:[#allocation8 + $0x1f8] sm:$0xff]  ;;  %v383_v31 = vld [vmem:[#allocation8 + $0x1c0] sm:$0xff]  ;;  %v296_v33 = vld [vmem:[%s2740_s19 + $0x8] sm:$0xff]  ;;  %v1073_v10 = vsub.s32 1, %v1068_v5  ;;  %v1077_v11 = vsub.s32 2, %v1068_v5 }
  0x88   : > { %393 = vperm.xlu0 %2311, %v295_v21   ;;  %403 = vperm.xlu1 %2312, %v297_v25   ;;  %v387_v32 = vld [vmem:[#allocation8 + $0x1e0] sm:$0xff]  ;;  %v2223_v34 = vpack.c.bf16 %v390_v27, %v386_v26  ;;  %v385_v35 = vld [vmem:[#allocation8 + $0x1d0] sm:$0xff]  ;;  %v298_v37 = vld [vmem:[%s2740_s19 + $0x18] sm:$0xff] }
  0x89   : > { %v389_v36 = vld [vmem:[#allocation8 + $0x1f0] sm:$0xff]  ;;  %v2193_v38 = vpack.c.bf16 %v387_v32, %v383_v31  ;;  %v299_v40 = vld [vmem:[%s2740_s19 + $0x20] sm:$0xff]  ;;  %v300_v41 = vld [vmem:[%s2740_s19 + $0x28] sm:$0xff] }
  0x8a   : > { %2186 = vmatpush1.bf16.msra.mxu0 %v2185_v14  ;;  %2218 = vmatpush1.bf16.msra.mxu1 %v2217_v17  ;;  %v2225_v39 = vpack.c.bf16 %v389_v36, %v385_v35  ;;  %v301_v42 = vld [vmem:[%s2740_s19 + $0x30] sm:$0xff]  ;;  %v302_v43 = vld [vmem:[%s2740_s19 + $0x38] sm:$0xff]  ;;  %v303_v44 = vld [vmem:[%s2740_s19 + $0x40] sm:$0xff] }
  0x8b   : > { %2188 = vmatprep.subr.bf16.mxu0 %v2187_v18  ;;  %2220 = vmatprep.subr.bf16.mxu1 %v2219_v22  ;;  %v2772_v45 = vld [vmem:[%s2740_s19 + $0x48] sm:$0xff]  ;;  %v2778_v46 = vld [vmem:[%s2740_s19 + $0x50] sm:$0xff]  ;;  %v2781_v47 = vld [vmem:[%s2740_s19 + $0x58] sm:$0xff] }
  0x8c   : > { %398 = vperm.xlu0 %2311, %v296_v33   ;;  %408 = vperm.xlu1 %2312, %v298_v37   ;;  %v2788_v48 = vld [vmem:[%s2740_s19 + $0x60] sm:$0xff]  ;;  %v2791_v49 = vld [vmem:[%s2740_s19 + $0x68] sm:$0xff]  ;;  %v2798_v50 = vld [vmem:[%s2740_s19 + $0x70] sm:$0xff] }
  0x8d   : > { %v2801_v51 = vld [vmem:[%s2740_s19 + $0x78] sm:$0xff]  ;;  %v2808_v52 = vld [vmem:[%s2740_s19 + $0x80] sm:$0xff]  ;;  %v2811_v53 = vld [vmem:[%s2740_s19 + $0x88] sm:$0xff] }
  0x8e   : > { %2190 = vmatpush1.bf16.msra.mxu0 %v2189_v28  ;;  %2222 = vmatpush1.bf16.msra.mxu1 %v2221_v29  ;;  %v2818_v54 = vld [vmem:[%s2740_s19 + $0x90] sm:$0xff]  ;;  %v2821_v55 = vld [vmem:[%s2740_s19 + $0x98] sm:$0xff]  ;;  %v2828_v56 = vld [vmem:[%s2740_s19 + $0xa0] sm:$0xff] }
  0x8f   : > { %2192 = vmatprep.subr.bf16.mxu0 %v2191_v30  ;;  %2224 = vmatprep.subr.bf16.mxu1 %v2223_v34  ;;  %v2831_v57 = vld [vmem:[%s2740_s19 + $0xa8] sm:$0xff]  ;;  %v2838_v58 = vld [vmem:[%s2740_s19 + $0xb0] sm:$0xff]  ;;  %v2841_v59 = vld [vmem:[%s2740_s19 + $0xb8] sm:$0xff] }
  0x90   : > { %413 = vperm.xlu0 %2311, %v299_v40   ;;  %418 = vperm.xlu1 %2312, %v300_v41   ;;  %v2848_v60 = vld [vmem:[%s2740_s19 + $0xc0] sm:$0xff]  ;;  %v2851_v61 = vld [vmem:[%s2740_s19 + $0xc8] sm:$0xff]  ;;  %v2860_v62 = vld [vmem:[%s2740_s19 + $0xd0] sm:$0xff] }
  0x91   : > { %v2863_v63 = vld [vmem:[%s2740_s19 + $0xd8] sm:$0xff]  ;;  %v2872_v0 = vld [vmem:[%s2740_s19 + $0xe0] sm:$0xff]  ;;  %v2875_v1 = vld [vmem:[%s2740_s19 + $0xe8] sm:$0xff] }
  0x92   : > { %2194 = vmatpush1.bf16.msra.mxu0 %v2193_v38  ;;  %2226 = vmatpush1.bf16.msra.mxu1 %v2225_v39  ;;  %v2884_v2 = vld [vmem:[%s2740_s19 + $0xf0] sm:$0xff]  ;;  %v2887_v3 = vld [vmem:[%s2740_s19 + $0xf8] sm:$0xff]  ;;  %v1215_v19 = vld [vmem:[#allocation2] sm:$0xff] }
  0x93   : > { %v1065_v9 = vld [vmem:[%s3564_s3] sm:$0xf]  ;;  %v1216_v35 = vld [vmem:[#allocation2 + $0x8] sm:$0xff] }
  0x94   : > { %423 = vperm.xlu0 %2311, %v301_v42   ;;  %428 = vperm.xlu1 %2312, %v302_v43   ;;  %v2972_v12 = vrot.slane %v1065_v9, %v1069_v6  ;;  %v2974_v14 = vrot.slane %v1065_v9, %v1073_v10  ;;  %v2976_v18 = vrot.slane %v1065_v9, %v1077_v11 }
  0x95   : > { %616 = vmatmul.mubr.f32.vlgmr.msra.gmra.mrb[0].mxu0 %v295_v21  ;;  %873 = vmatmul.mubr.f32.vlgmr.msra.gmra.mrb[0].mxu1 %v295_v21 }
  0x96   : > { %621 = vmatprep.mubr.f32.mxu0 %v2543_v8  ;;  %878 = vmatprep.mubr.f32.mxu1 %v2543_v8 }
  0x98   : > { %433 = vperm.xlu0 %2311, %v303_v44   ;;  %438 = vperm.xlu1 %2312, %v2772_v45  }
  0x99   : > { %622 = vmatmul.mubr.f32.gmra.mrb[2].mxu0 %v296_v33  ;;  %879 = vmatmul.mubr.f32.gmra.mrb[2].mxu1 %v296_v33 }
  0x9a   : > { %627 = vmatprep.mubr.f32.mxu0 %v2543_v8  ;;  %884 = vmatprep.mubr.f32.mxu1 %v2543_v8 }
  0x9c   : > { %443 = vperm.xlu0 %2311, %v2778_v46   ;;  %448 = vperm.xlu1 %2312, %v2781_v47  }
  0x9d   : > { %628 = vmatmul.mubr.f32.gmra.mrb[4].mxu0 %v297_v25  ;;  %885 = vmatmul.mubr.f32.gmra.mrb[4].mxu1 %v297_v25 }
  0x9e   : > { %633 = vmatprep.mubr.f32.mxu0 %v2543_v8  ;;  %890 = vmatprep.mubr.f32.mxu1 %v2543_v8 }
  0xa0   : > { %453 = vperm.xlu0 %2311, %v2788_v48   ;;  %458 = vperm.xlu1 %2312, %v2791_v49  }
  0xa1   : > { %634 = vmatmul.mubr.f32.gmra.mrb[6].mxu0 %v298_v37  ;;  %891 = vmatmul.mubr.f32.gmra.mrb[6].mxu1 %v298_v37 }
  0xa2   : > { %639 = vmatprep.mubr.f32.mxu0 %v2543_v8  ;;  %896 = vmatprep.mubr.f32.mxu1 %v2543_v8 }
  0xa4   : > { %463 = vperm.xlu0 %2311, %v2798_v50   ;;  %468 = vperm.xlu1 %2312, %v2801_v51  }
  0xa5   : > { %640 = vmatmul.mubr.f32.gmra.mrb[8].mxu0 %v299_v40  ;;  %897 = vmatmul.mubr.f32.gmra.mrb[8].mxu1 %v299_v40 }
  0xa6   : > { %645 = vmatprep.mubr.f32.mxu0 %v2543_v8  ;;  %902 = vmatprep.mubr.f32.mxu1 %v2543_v8 }
  0xa8   : > { %473 = vperm.xlu0 %2311, %v2808_v52   ;;  %478 = vperm.xlu1 %2312, %v2811_v53  }
  0xa9   : > { %646 = vmatmul.mubr.f32.gmra.mrb[10].mxu0 %v300_v41  ;;  %903 = vmatmul.mubr.f32.gmra.mrb[10].mxu1 %v300_v41 }
  0xaa   : > { %651 = vmatprep.mubr.f32.mxu0 %v2543_v8  ;;  %908 = vmatprep.mubr.f32.mxu1 %v2543_v8 }
  0xac   : > { %483 = vperm.xlu0 %2311, %v2818_v54   ;;  %488 = vperm.xlu1 %2312, %v2821_v55  }
  0xad   : > { %652 = vmatmul.mubr.f32.gmra.mrb[12].mxu0 %v301_v42  ;;  %909 = vmatmul.mubr.f32.gmra.mrb[12].mxu1 %v301_v42 }
  0xae   : > { %657 = vmatprep.mubr.f32.mxu0 %v2543_v8  ;;  %914 = vmatprep.mubr.f32.mxu1 %v2543_v8 }
  0xb0   : > { %493 = vperm.xlu0 %2311, %v2828_v56   ;;  %498 = vperm.xlu1 %2312, %v2831_v57  }
  0xb1   : > { %658 = vmatmul.mubr.f32.gmra.mrb[14].mxu0 %v302_v43  ;;  %915 = vmatmul.mubr.f32.gmra.mrb[14].mxu1 %v302_v43 }
  0xb2   : > { %663 = vmatprep.mubr.f32.mxu0 %v2543_v8  ;;  %920 = vmatprep.mubr.f32.mxu1 %v2543_v8 }
  0xb4   : > { %503 = vperm.xlu0 %2311, %v2838_v58   ;;  %508 = vperm.xlu1 %2312, %v2841_v59  }
  0xb5   : > { %664 = vmatmul.mubr.f32.gmra.mrb[16].mxu0 %v303_v44  ;;  %921 = vmatmul.mubr.f32.gmra.mrb[16].mxu1 %v303_v44 }
  0xb6   : > { %669 = vmatprep.mubr.f32.mxu0 %v2543_v8  ;;  %926 = vmatprep.mubr.f32.mxu1 %v2543_v8 }
  0xb8   : > { %513 = vperm.xlu0 %2311, %v2848_v60   ;;  %518 = vperm.xlu1 %2312, %v2851_v61  }
  0xb9   : > { %670 = vmatmul.mubr.f32.gmra.mrb[18].mxu0 %v2772_v45  ;;  %927 = vmatmul.mubr.f32.gmra.mrb[18].mxu1 %v2772_v45 }
  0xba   : > { %675 = vmatprep.mubr.f32.mxu0 %v2543_v8  ;;  %932 = vmatprep.mubr.f32.mxu1 %v2543_v8 }
  0xbc   : > { %523 = vperm.xlu0 %2311, %v2860_v62   ;;  %528 = vperm.xlu1 %2312, %v2863_v63  }
  0xbd   : > { %676 = vmatmul.mubr.f32.gmra.mrb[20].mxu0 %v2778_v46  ;;  %933 = vmatmul.mubr.f32.gmra.mrb[20].mxu1 %v2778_v46 }
  0xbe   : > { %681 = vmatprep.mubr.f32.mxu0 %v2543_v8  ;;  %938 = vmatprep.mubr.f32.mxu1 %v2543_v8 }
  0xc0   : > { %533 = vperm.xlu0 %2311, %v2872_v0   ;;  %538 = vperm.xlu1 %2312, %v2875_v1  }
  0xc1   : > { %682 = vmatmul.mubr.f32.gmra.mrb[22].mxu0 %v2781_v47  ;;  %939 = vmatmul.mubr.f32.gmra.mrb[22].mxu1 %v2781_v47 }
  0xc2   : > { %687 = vmatprep.mubr.f32.mxu0 %v2543_v8  ;;  %944 = vmatprep.mubr.f32.mxu1 %v2543_v8 }
  0xc4   : > { %543 = vperm.xlu0 %2311, %v2884_v2   ;;  %548 = vperm.xlu1 %2312, %v2887_v3  }
  0xc5   : > { %688 = vmatmul.mubr.f32.gmra.mrb[24].mxu0 %v2788_v48  ;;  %945 = vmatmul.mubr.f32.gmra.mrb[24].mxu1 %v2788_v48 }
  0xc6   : > { %693 = vmatprep.mubr.f32.mxu0 %v2543_v8  ;;  %950 = vmatprep.mubr.f32.mxu1 %v2543_v8 }
  0xc9   : > { %694 = vmatmul.mubr.f32.gmra.mrb[26].mxu0 %v2791_v49  ;;  %951 = vmatmul.mubr.f32.gmra.mrb[26].mxu1 %v2791_v49 }
  0xca   : > { %699 = vmatprep.mubr.f32.mxu0 %v2543_v8  ;;  %956 = vmatprep.mubr.f32.mxu1 %v2543_v8 }
  0xcd   : > { %700 = vmatmul.mubr.f32.gmra.mrb[28].mxu0 %v2798_v50  ;;  %957 = vmatmul.mubr.f32.gmra.mrb[28].mxu1 %v2798_v50 }
  0xce   : > { %705 = vmatprep.mubr.f32.mxu0 %v2543_v8  ;;  %962 = vmatprep.mubr.f32.mxu1 %v2543_v8 }
  0xd1   : > { %706 = vmatmul.mubr.f32.gmra.mrb[30].mxu0 %v2801_v51  ;;  %963 = vmatmul.mubr.f32.gmra.mrb[30].mxu1 %v2801_v51  ;;  %v1217_v51 = vld [vmem:[#allocation2 + $0x10] sm:$0xff] }
  0xd2   : > { %711 = vmatprep.mubr.f32.mxu0 %v2543_v8  ;;  %968 = vmatprep.mubr.f32.mxu1 %v2543_v8 }
  0xd5   : > { %712 = vmatmul.mubr.f32.gmra.mrb[32].mxu0 %v2808_v52  ;;  %969 = vmatmul.mubr.f32.gmra.mrb[32].mxu1 %v2808_v52 }
  0xd6   : > { %717 = vmatprep.mubr.f32.mxu0 %v2543_v8  ;;  %974 = vmatprep.mubr.f32.mxu1 %v2543_v8 }
  0xd9   : > { %718 = vmatmul.mubr.f32.gmra.mrb[34].mxu0 %v2811_v53  ;;  %975 = vmatmul.mubr.f32.gmra.mrb[34].mxu1 %v2811_v53 }
  0xda   : > { %723 = vmatprep.mubr.f32.mxu0 %v2543_v8  ;;  %980 = vmatprep.mubr.f32.mxu1 %v2543_v8 }
  0xdd   : > { %724 = vmatmul.mubr.f32.gmra.mrb[36].mxu0 %v2818_v54  ;;  %981 = vmatmul.mubr.f32.gmra.mrb[36].mxu1 %v2818_v54 }
  0xde   : > { %729 = vmatprep.mubr.f32.mxu0 %v2543_v8  ;;  %986 = vmatprep.mubr.f32.mxu1 %v2543_v8 }
  0xe1   : > { %730 = vmatmul.mubr.f32.gmra.mrb[38].mxu0 %v2821_v55  ;;  %987 = vmatmul.mubr.f32.gmra.mrb[38].mxu1 %v2821_v55 }
  0xe2   : > { %735 = vmatprep.mubr.f32.mxu0 %v2543_v8  ;;  %992 = vmatprep.mubr.f32.mxu1 %v2543_v8 }
  0xe5   : > { %736 = vmatmul.mubr.f32.gmra.mrb[40].mxu0 %v2828_v56  ;;  %993 = vmatmul.mubr.f32.gmra.mrb[40].mxu1 %v2828_v56 }
  0xe6   : > { %741 = vmatprep.mubr.f32.mxu0 %v2543_v8  ;;  %998 = vmatprep.mubr.f32.mxu1 %v2543_v8 }
  0xe9   : > { %742 = vmatmul.mubr.f32.gmra.mrb[42].mxu0 %v2831_v57  ;;  %999 = vmatmul.mubr.f32.gmra.mrb[42].mxu1 %v2831_v57 }
  0xea   : > { %747 = vmatprep.mubr.f32.mxu0 %v2543_v8  ;;  %1004 = vmatprep.mubr.f32.mxu1 %v2543_v8 }
  0xed   : > { %748 = vmatmul.mubr.f32.gmra.mrb[44].mxu0 %v2838_v58  ;;  %1005 = vmatmul.mubr.f32.gmra.mrb[44].mxu1 %v2838_v58 }
  0xee   : > { %753 = vmatprep.mubr.f32.mxu0 %v2543_v8  ;;  %1010 = vmatprep.mubr.f32.mxu1 %v2543_v8 }
  0xf1   : > { %754 = vmatmul.mubr.f32.gmra.mrb[46].mxu0 %v2841_v59  ;;  %1011 = vmatmul.mubr.f32.gmra.mrb[46].mxu1 %v2841_v59 }
  0xf2   : > { %759 = vmatprep.mubr.f32.mxu0 %v2543_v8  ;;  %1016 = vmatprep.mubr.f32.mxu1 %v2543_v8 }
  0xf5   : > { %760 = vmatmul.mubr.f32.gmra.mrb[48].mxu0 %v2848_v60  ;;  %1017 = vmatmul.mubr.f32.gmra.mrb[48].mxu1 %v2848_v60 }
  0xf6   : > { %765 = vmatprep.mubr.f32.mxu0 %v2543_v8  ;;  %1022 = vmatprep.mubr.f32.mxu1 %v2543_v8 }
  0xf9   : > { %766 = vmatmul.mubr.f32.gmra.mrb[50].mxu0 %v2851_v61  ;;  %1023 = vmatmul.mubr.f32.gmra.mrb[50].mxu1 %v2851_v61 }
  0xfa   : > { %771 = vmatprep.mubr.f32.mxu0 %v2543_v8  ;;  %1028 = vmatprep.mubr.f32.mxu1 %v2543_v8 }
  0xfd   : > { %772 = vmatmul.mubr.f32.gmra.mrb[52].mxu0 %v2860_v62  ;;  %1029 = vmatmul.mubr.f32.gmra.mrb[52].mxu1 %v2860_v62 }
  0xfe   : > { %777 = vmatprep.mubr.f32.mxu0 %v2543_v8  ;;  %1034 = vmatprep.mubr.f32.mxu1 %v2543_v8 }
 0x101   : > { %778 = vmatmul.mubr.f32.gmra.mrb[54].mxu0 %v2863_v63  ;;  %1035 = vmatmul.mubr.f32.gmra.mrb[54].mxu1 %v2863_v63 }
 0x102   : > { %783 = vmatprep.mubr.f32.mxu0 %v2543_v8  ;;  %1040 = vmatprep.mubr.f32.mxu1 %v2543_v8 }
 0x105   : > { %784 = vmatmul.mubr.f32.gmra.mrb[56].mxu0 %v2872_v0  ;;  %1041 = vmatmul.mubr.f32.gmra.mrb[56].mxu1 %v2872_v0 }
 0x106   : > { %789 = vmatprep.mubr.f32.mxu0 %v2543_v8  ;;  %1046 = vmatprep.mubr.f32.mxu1 %v2543_v8 }
 0x107   : > { %v394_v7 = vpop.permute.xlu0 %393  ;;  %v404_v34 = vpop.permute.xlu1 %403 }
 0x109   : > { %790 = vmatmul.mubr.f32.gmra.mrb[58].mxu0 %v2875_v1  ;;  %1047 = vmatmul.mubr.f32.gmra.mrb[58].mxu1 %v2875_v1 }
 0x10a   : > { %795 = vmatprep.mubr.f32.mxu0 %v2543_v8  ;;  %1052 = vmatprep.mubr.f32.mxu1 %v2543_v8 }
 0x10b   : > { %v399_v22 = vpop.permute.xlu0 %398  ;;  %v409_v58 = vpop.permute.xlu1 %408 }
 0x10d   : > { %796 = vmatmul.mubr.f32.gmra.mrb[60].mxu0 %v2884_v2  ;;  %1053 = vmatmul.mubr.f32.gmra.mrb[60].mxu1 %v2884_v2 }
 0x10e   : > { %801 = vmatprep.mubr.f32.mxu0 %v2543_v8  ;;  %1058 = vmatprep.mubr.f32.mxu1 %v2543_v8  ;;  %v1081_v8 = vsub.s32 3, %v1068_v5  ;;  %v1218_v5 = vld [vmem:[#allocation2 + $0x18] sm:$0xff] }
 0x110   : > { %v2980_v28 = vrot.slane %v1065_v9, %v1081_v8  ;;  %v414_v8 = vpop.permute.xlu0 %413 }
 0x111   : > { %802 = vmatmul.mubr.f32.gmra.mrb[62].mxu0 %v2887_v3  ;;  %1059 = vmatmul.mubr.f32.gmra.mrb[62].mxu1 %v2887_v3 }
 0x168   : > { %v617_v13 = vpop.f32.mrb[0].mxu0  ;;  %v874_v17 = vpop.f32.mrb[0].mxu1 }
 0x169   : > { %v618_v15 = vadd.f32 %v617_v13, %v394_v7  ;;  %v619_v16 = vpop.f32.mrb[1].mxu0  ;;  %v875_v21 = vadd.f32 %v874_v17, %v394_v7  ;;  %v876_v23 = vpop.f32.mrb[1].mxu1 }
 0x16a   : > { %v620_v20 = vadd.f32 %v619_v16, %v394_v7  ;;  %v877_v27 = vadd.f32 %v876_v23, %v394_v7 }
 0x16b   : > { %v1087_v24 = vadd.f32 %v2972_v12, %v618_v15  ;;  %v1089_v30 = vadd.f32 %v2976_v18, %v875_v21 }
 0x16c   : > { %v1088_v25 = vadd.f32 %v2974_v14, %v620_v20  ;;  %v623_v26 = vpop.f32.mrb[2].mxu0  ;;  %v880_v33 = vpop.f32.mrb[2].mxu1  ;;  %v1090_v41 = vadd.f32 %v2980_v28, %v877_v27 }
 0x16d   : > { %v1247_v29 = vmin.f32 %v1215_v19, %v1087_v24  ;;  %v624_v31 = vadd.f32 %v623_v26, %v399_v22  ;;  %v625_v32 = vpop.f32.mrb[3].mxu0  ;;  %v881_v37 = vadd.f32 %v880_v33, %v399_v22  ;;  %v882_v38 = vpop.f32.mrb[3].mxu1  ;;  %v1219_v26 = vld [vmem:[#allocation2 + $0x20] sm:$0xff] }
 0x16e   : > { %v626_v36 = vadd.f32 %v625_v32, %v399_v22  ;;  %v883_v44 = vadd.f32 %v882_v38, %v399_v22 }
 0x16f   : > { %v1279_v39 = vmin.f32 %v1247_v29, %v1088_v25  ;;  %v1091_v40 = vadd.f32 %v2972_v12, %v624_v31  ;;  %v1093_v47 = vadd.f32 %v2976_v18, %v881_v37 }
 0x170   : > { %v1092_v42 = vadd.f32 %v2974_v14, %v626_v36  ;;  %v629_v43 = vpop.f32.mrb[4].mxu0  ;;  %v886_v50 = vpop.f32.mrb[4].mxu1  ;;  %v1094_v59 = vadd.f32 %v2980_v28, %v883_v44 }
 0x171   : > { %v1311_v45 = vmin.f32 %v1279_v39, %v1089_v30  ;;  %v1248_v46 = vmin.f32 %v1216_v35, %v1091_v40  ;;  %v630_v48 = vadd.f32 %v629_v43, %v404_v34  ;;  %v631_v49 = vpop.f32.mrb[5].mxu0  ;;  %v887_v53 = vadd.f32 %v886_v50, %v404_v34  ;;  %v888_v54 = vpop.f32.mrb[5].mxu1 }
 0x172   : > { %v632_v52 = vadd.f32 %v631_v49, %v404_v34  ;;  %v889_v62 = vadd.f32 %v888_v54, %v404_v34  ;;  %v419_v34 = vpop.permute.xlu1 %418 }
 0x173   : > { %v1343_v55 = vmin.f32 %v1311_v45, %v1090_v41  ;;  %v1280_v56 = vmin.f32 %v1248_v46, %v1092_v42  ;;  %v1095_v57 = vadd.f32 %v2972_v12, %v630_v48  ;;  %v1097_v1 = vadd.f32 %v2976_v18, %v887_v53  ;;  %v1220_v45 = vld [vmem:[#allocation2 + $0x28] sm:$0xff] }
 0x174   : > { %v1096_v60 = vadd.f32 %v2974_v14, %v632_v52  ;;  %v635_v61 = vpop.f32.mrb[6].mxu0  ;;  %v892_v4 = vpop.f32.mrb[6].mxu1  ;;  %v1098_v15 = vadd.f32 %v2980_v28, %v889_v62 }
 0x175   : > { %1375 = vst [vmem:[#allocation2] sm:$0xff] %v1343_v55  ;;  %v1312_v63 = vmin.f32 %v1280_v56, %v1093_v47  ;;  %v1249_v0 = vmin.f32 %v1217_v51, %v1095_v57  ;;  %v636_v2 = vadd.f32 %v635_v61, %v409_v58  ;;  %v637_v3 = vpop.f32.mrb[7].mxu0  ;;  %v893_v7 = vadd.f32 %v892_v4, %v409_v58  ;;  %v894_v9 = vpop.f32.mrb[7].mxu1 }
 0x176   : > { %v638_v6 = vadd.f32 %v637_v3, %v409_v58  ;;  %v895_v19 = vadd.f32 %v894_v9, %v409_v58  ;;  %v424_v52 = vpop.permute.xlu0 %423 }
 0x177   : > { %v1344_v10 = vmin.f32 %v1312_v63, %v1094_v59  ;;  %v1281_v11 = vmin.f32 %v1249_v0, %v1096_v60  ;;  %v1099_v13 = vadd.f32 %v2972_v12, %v636_v2  ;;  %v1101_v22 = vadd.f32 %v2976_v18, %v893_v7  ;;  %v1221_v63 = vld [vmem:[#allocation2 + $0x30] sm:$0xff] }
 0x178   : > { %v1100_v16 = vadd.f32 %v2974_v14, %v638_v6  ;;  %v641_v17 = vpop.f32.mrb[8].mxu0  ;;  %v898_v25 = vpop.f32.mrb[8].mxu1  ;;  %v1102_v35 = vadd.f32 %v2980_v28, %v895_v19 }
 0x179   : > { %1376 = vst [vmem:[#allocation2 + $0x8] sm:$0xff] %v1344_v10  ;;  %v1313_v20 = vmin.f32 %v1281_v11, %v1097_v1  ;;  %v1250_v21 = vmin.f32 %v1218_v5, %v1099_v13  ;;  %v642_v23 = vadd.f32 %v641_v17, %v414_v8  ;;  %v643_v24 = vpop.f32.mrb[9].mxu0  ;;  %v899_v29 = vadd.f32 %v898_v25, %v414_v8  ;;  %v900_v30 = vpop.f32.mrb[9].mxu1 }
 0x17a   : > { %v644_v27 = vadd.f32 %v643_v24, %v414_v8  ;;  %v901_v38 = vadd.f32 %v900_v30, %v414_v8  ;;  %v429_v6 = vpop.permute.xlu1 %428 }
 0x17b   : > { %v1345_v31 = vmin.f32 %v1313_v20, %v1098_v15  ;;  %v1282_v32 = vmin.f32 %v1250_v21, %v1100_v16  ;;  %v1103_v33 = vadd.f32 %v2972_v12, %v642_v23  ;;  %v1105_v41 = vadd.f32 %v2976_v18, %v899_v29  ;;  %v1222_v20 = vld [vmem:[#allocation2 + $0x38] sm:$0xff] }
 0x17c   : > { %v1104_v36 = vadd.f32 %v2974_v14, %v644_v27  ;;  %v647_v37 = vpop.f32.mrb[10].mxu0  ;;  %v904_v44 = vpop.f32.mrb[10].mxu1  ;;  %v1106_v53 = vadd.f32 %v2980_v28, %v901_v38 }
 0x17d   : > { %1377 = vst [vmem:[#allocation2 + $0x10] sm:$0xff] %v1345_v31  ;;  %v1314_v39 = vmin.f32 %v1282_v32, %v1101_v22  ;;  %v1251_v40 = vmin.f32 %v1219_v26, %v1103_v33  ;;  %v648_v42 = vadd.f32 %v647_v37, %v419_v34  ;;  %v649_v43 = vpop.f32.mrb[11].mxu0  ;;  %v905_v47 = vadd.f32 %v904_v44, %v419_v34  ;;  %v906_v48 = vpop.f32.mrb[11].mxu1 }
 0x17e   : > { %v650_v46 = vadd.f32 %v649_v43, %v419_v34  ;;  %v907_v56 = vadd.f32 %v906_v48, %v419_v34  ;;  %v434_v27 = vpop.permute.xlu0 %433 }
 0x17f   : > { %v1346_v49 = vmin.f32 %v1314_v39, %v1102_v35  ;;  %v1283_v50 = vmin.f32 %v1251_v40, %v1104_v36  ;;  %v1107_v51 = vadd.f32 %v2972_v12, %v648_v42  ;;  %v1109_v59 = vadd.f32 %v2976_v18, %v905_v47  ;;  %v1223_v39 = vld [vmem:[#allocation2 + $0x40] sm:$0xff] }
 0x180   : > { %v1108_v54 = vadd.f32 %v2974_v14, %v650_v46  ;;  %v653_v55 = vpop.f32.mrb[12].mxu0  ;;  %v910_v62 = vpop.f32.mrb[12].mxu1  ;;  %v1110_v7 = vadd.f32 %v2980_v28, %v907_v56 }
 0x181   : > { %1378 = vst [vmem:[#allocation2 + $0x18] sm:$0xff] %v1346_v49  ;;  %v1315_v57 = vmin.f32 %v1283_v50, %v1105_v41  ;;  %v1252_v58 = vmin.f32 %v1220_v45, %v1107_v51  ;;  %v654_v60 = vadd.f32 %v653_v55, %v424_v52  ;;  %v655_v61 = vpop.f32.mrb[13].mxu0  ;;  %v911_v1 = vadd.f32 %v910_v62, %v424_v52  ;;  %v912_v2 = vpop.f32.mrb[13].mxu1 }
 0x182   : > { %v656_v0 = vadd.f32 %v655_v61, %v424_v52  ;;  %v913_v11 = vadd.f32 %v912_v2, %v424_v52  ;;  %v439_v46 = vpop.permute.xlu1 %438 }
 0x183   : > { %v1347_v3 = vmin.f32 %v1315_v57, %v1106_v53  ;;  %v1284_v4 = vmin.f32 %v1252_v58, %v1108_v54  ;;  %v1111_v5 = vadd.f32 %v2972_v12, %v654_v60  ;;  %v1113_v15 = vadd.f32 %v2976_v18, %v911_v1  ;;  %v1224_v57 = vld [vmem:[#allocation2 + $0x48] sm:$0xff] }
 0x184   : > { %v1112_v9 = vadd.f32 %v2974_v14, %v656_v0  ;;  %v659_v10 = vpop.f32.mrb[14].mxu0  ;;  %v916_v19 = vpop.f32.mrb[14].mxu1  ;;  %v1114_v29 = vadd.f32 %v2980_v28, %v913_v11 }
 0x185   : > { %1379 = vst [vmem:[#allocation2 + $0x20] sm:$0xff] %v1347_v3  ;;  %v1316_v13 = vmin.f32 %v1284_v4, %v1109_v59  ;;  %v1253_v8 = vmin.f32 %v1221_v63, %v1111_v5  ;;  %v660_v16 = vadd.f32 %v659_v10, %v429_v6  ;;  %v661_v17 = vpop.f32.mrb[15].mxu0  ;;  %v917_v22 = vadd.f32 %v916_v19, %v429_v6  ;;  %v918_v23 = vpop.f32.mrb[15].mxu1 }
 0x186   : > { %v662_v21 = vadd.f32 %v661_v17, %v429_v6  ;;  %v919_v32 = vadd.f32 %v918_v23, %v429_v6  ;;  %v444_v0 = vpop.permute.xlu0 %443 }
 0x187   : > { %v1348_v24 = vmin.f32 %v1316_v13, %v1110_v7  ;;  %v1285_v25 = vmin.f32 %v1253_v8, %v1112_v9  ;;  %v1115_v26 = vadd.f32 %v2972_v12, %v660_v16  ;;  %v1117_v35 = vadd.f32 %v2976_v18, %v917_v22  ;;  %v1225_v13 = vld [vmem:[#allocation2 + $0x50] sm:$0xff] }
 0x188   : > { %v1116_v30 = vadd.f32 %v2974_v14, %v662_v21  ;;  %v665_v31 = vpop.f32.mrb[16].mxu0  ;;  %v922_v38 = vpop.f32.mrb[16].mxu1  ;;  %v1118_v47 = vadd.f32 %v2980_v28, %v919_v32 }
 0x189   : > { %1380 = vst [vmem:[#allocation2 + $0x28] sm:$0xff] %v1348_v24  ;;  %v1317_v33 = vmin.f32 %v1285_v25, %v1113_v15  ;;  %v1254_v34 = vmin.f32 %v1222_v20, %v1115_v26  ;;  %v666_v36 = vadd.f32 %v665_v31, %v434_v27  ;;  %v667_v37 = vpop.f32.mrb[17].mxu0  ;;  %v923_v41 = vadd.f32 %v922_v38, %v434_v27  ;;  %v924_v42 = vpop.f32.mrb[17].mxu1 }
 0x18a   : > { %v668_v40 = vadd.f32 %v667_v37, %v434_v27  ;;  %v925_v50 = vadd.f32 %v924_v42, %v434_v27  ;;  %v449_v21 = vpop.permute.xlu1 %448 }
 0x18b   : > { %v1349_v43 = vmin.f32 %v1317_v33, %v1114_v29  ;;  %v1286_v44 = vmin.f32 %v1254_v34, %v1116_v30  ;;  %v1119_v45 = vadd.f32 %v2972_v12, %v666_v36  ;;  %v1121_v53 = vadd.f32 %v2976_v18, %v923_v41  ;;  %v1226_v33 = vld [vmem:[#allocation2 + $0x58] sm:$0xff] }
 0x18c   : > { %v1120_v48 = vadd.f32 %v2974_v14, %v668_v40  ;;  %v671_v49 = vpop.f32.mrb[18].mxu0  ;;  %v928_v56 = vpop.f32.mrb[18].mxu1  ;;  %v1122_v1 = vadd.f32 %v2980_v28, %v925_v50 }
 0x18d   : > { %1381 = vst [vmem:[#allocation2 + $0x30] sm:$0xff] %v1349_v43  ;;  %v1318_v51 = vmin.f32 %v1286_v44, %v1117_v35  ;;  %v1255_v52 = vmin.f32 %v1223_v39, %v1119_v45  ;;  %v672_v54 = vadd.f32 %v671_v49, %v439_v46  ;;  %v673_v55 = vpop.f32.mrb[19].mxu0  ;;  %v929_v59 = vadd.f32 %v928_v56, %v439_v46  ;;  %v930_v60 = vpop.f32.mrb[19].mxu1 }
 0x18e   : > { %v674_v58 = vadd.f32 %v673_v55, %v439_v46  ;;  %v931_v4 = vadd.f32 %v930_v60, %v439_v46  ;;  %v454_v40 = vpop.permute.xlu0 %453 }
 0x18f   : > { %v1350_v61 = vmin.f32 %v1318_v51, %v1118_v47  ;;  %v1287_v62 = vmin.f32 %v1255_v52, %v1120_v48  ;;  %v1123_v63 = vadd.f32 %v2972_v12, %v672_v54  ;;  %v1125_v7 = vadd.f32 %v2976_v18, %v929_v59  ;;  %v1227_v51 = vld [vmem:[#allocation2 + $0x60] sm:$0xff] }
 0x190   : > { %v1124_v2 = vadd.f32 %v2974_v14, %v674_v58  ;;  %v677_v3 = vpop.f32.mrb[20].mxu0  ;;  %v934_v11 = vpop.f32.mrb[20].mxu1  ;;  %v1126_v22 = vadd.f32 %v2980_v28, %v931_v4 }
 0x191   : > { %1382 = vst [vmem:[#allocation2 + $0x38] sm:$0xff] %v1350_v61  ;;  %v1319_v5 = vmin.f32 %v1287_v62, %v1121_v53  ;;  %v1256_v6 = vmin.f32 %v1224_v57, %v1123_v63  ;;  %v678_v9 = vadd.f32 %v677_v3, %v444_v0  ;;  %v679_v10 = vpop.f32.mrb[21].mxu0  ;;  %v935_v15 = vadd.f32 %v934_v11, %v444_v0  ;;  %v936_v16 = vpop.f32.mrb[21].mxu1 }
 0x192   : > { %v680_v8 = vadd.f32 %v679_v10, %v444_v0  ;;  %v937_v25 = vadd.f32 %v936_v16, %v444_v0  ;;  %v459_v58 = vpop.permute.xlu1 %458 }
 0x193   : > { %v1351_v17 = vmin.f32 %v1319_v5, %v1122_v1  ;;  %v1288_v19 = vmin.f32 %v1256_v6, %v1124_v2  ;;  %v1127_v20 = vadd.f32 %v2972_v12, %v678_v9  ;;  %v1129_v29 = vadd.f32 %v2976_v18, %v935_v15  ;;  %v1228_v5 = vld [vmem:[#allocation2 + $0x68] sm:$0xff] }
 0x194   : > { %v1128_v23 = vadd.f32 %v2974_v14, %v680_v8  ;;  %v683_v24 = vpop.f32.mrb[22].mxu0  ;;  %v940_v32 = vpop.f32.mrb[22].mxu1  ;;  %v1130_v41 = vadd.f32 %v2980_v28, %v937_v25 }
 0x195   : > { %1383 = vst [vmem:[#allocation2 + $0x40] sm:$0xff] %v1351_v17  ;;  %v1320_v26 = vmin.f32 %v1288_v19, %v1125_v7  ;;  %v1257_v27 = vmin.f32 %v1225_v13, %v1127_v20  ;;  %v684_v30 = vadd.f32 %v683_v24, %v449_v21  ;;  %v685_v31 = vpop.f32.mrb[23].mxu0  ;;  %v941_v35 = vadd.f32 %v940_v32, %v449_v21  ;;  %v942_v36 = vpop.f32.mrb[23].mxu1 }
 0x196   : > { %v686_v34 = vadd.f32 %v685_v31, %v449_v21  ;;  %v943_v44 = vadd.f32 %v942_v36, %v449_v21  ;;  %v464_v8 = vpop.permute.xlu0 %463 }
 0x197   : > { %v1352_v37 = vmin.f32 %v1320_v26, %v1126_v22  ;;  %v1289_v38 = vmin.f32 %v1257_v27, %v1128_v23  ;;  %v1131_v39 = vadd.f32 %v2972_v12, %v684_v30  ;;  %v1133_v47 = vadd.f32 %v2976_v18, %v941_v35  ;;  %v1229_v26 = vld [vmem:[#allocation2 + $0x70] sm:$0xff] }
 0x198   : > { %v1132_v42 = vadd.f32 %v2974_v14, %v686_v34  ;;  %v689_v43 = vpop.f32.mrb[24].mxu0  ;;  %v946_v50 = vpop.f32.mrb[24].mxu1  ;;  %v1134_v59 = vadd.f32 %v2980_v28, %v943_v44 }
 0x199   : > { %1384 = vst [vmem:[#allocation2 + $0x48] sm:$0xff] %v1352_v37  ;;  %v1321_v45 = vmin.f32 %v1289_v38, %v1129_v29  ;;  %v1258_v46 = vmin.f32 %v1226_v33, %v1131_v39  ;;  %v690_v48 = vadd.f32 %v689_v43, %v454_v40  ;;  %v691_v49 = vpop.f32.mrb[25].mxu0  ;;  %v947_v53 = vadd.f32 %v946_v50, %v454_v40  ;;  %v948_v54 = vpop.f32.mrb[25].mxu1 }
 0x19a   : > { %v692_v52 = vadd.f32 %v691_v49, %v454_v40  ;;  %v949_v62 = vadd.f32 %v948_v54, %v454_v40  ;;  %v469_v34 = vpop.permute.xlu1 %468 }
 0x19b   : > { %v1353_v55 = vmin.f32 %v1321_v45, %v1130_v41  ;;  %v1290_v56 = vmin.f32 %v1258_v46, %v1132_v42  ;;  %v1135_v57 = vadd.f32 %v2972_v12, %v690_v48  ;;  %v1137_v1 = vadd.f32 %v2976_v18, %v947_v53  ;;  %v1230_v45 = vld [vmem:[#allocation2 + $0x78] sm:$0xff] }
 0x19c   : > { %v1136_v60 = vadd.f32 %v2974_v14, %v692_v52  ;;  %v695_v61 = vpop.f32.mrb[26].mxu0  ;;  %v952_v4 = vpop.f32.mrb[26].mxu1  ;;  %v1138_v15 = vadd.f32 %v2980_v28, %v949_v62 }
 0x19d   : > { %1385 = vst [vmem:[#allocation2 + $0x50] sm:$0xff] %v1353_v55  ;;  %v1322_v63 = vmin.f32 %v1290_v56, %v1133_v47  ;;  %v1259_v0 = vmin.f32 %v1227_v51, %v1135_v57  ;;  %v696_v2 = vadd.f32 %v695_v61, %v459_v58  ;;  %v697_v3 = vpop.f32.mrb[27].mxu0  ;;  %v953_v7 = vadd.f32 %v952_v4, %v459_v58  ;;  %v954_v9 = vpop.f32.mrb[27].mxu1 }
 0x19e   : > { %v698_v6 = vadd.f32 %v697_v3, %v459_v58  ;;  %v955_v19 = vadd.f32 %v954_v9, %v459_v58  ;;  %v474_v52 = vpop.permute.xlu0 %473 }
 0x19f   : > { %v1354_v10 = vmin.f32 %v1322_v63, %v1134_v59  ;;  %v1291_v11 = vmin.f32 %v1259_v0, %v1136_v60  ;;  %v1139_v13 = vadd.f32 %v2972_v12, %v696_v2  ;;  %v1141_v22 = vadd.f32 %v2976_v18, %v953_v7  ;;  %v1231_v63 = vld [vmem:[#allocation2 + $0x80] sm:$0xff] }
 0x1a0   : > { %v1140_v16 = vadd.f32 %v2974_v14, %v698_v6  ;;  %v701_v17 = vpop.f32.mrb[28].mxu0  ;;  %v958_v25 = vpop.f32.mrb[28].mxu1  ;;  %v1142_v35 = vadd.f32 %v2980_v28, %v955_v19 }
 0x1a1   : > { %1386 = vst [vmem:[#allocation2 + $0x58] sm:$0xff] %v1354_v10  ;;  %v1323_v20 = vmin.f32 %v1291_v11, %v1137_v1  ;;  %v1260_v21 = vmin.f32 %v1228_v5, %v1139_v13  ;;  %v702_v23 = vadd.f32 %v701_v17, %v464_v8  ;;  %v703_v24 = vpop.f32.mrb[29].mxu0  ;;  %v959_v29 = vadd.f32 %v958_v25, %v464_v8  ;;  %v960_v30 = vpop.f32.mrb[29].mxu1 }
 0x1a2   : > { %v704_v27 = vadd.f32 %v703_v24, %v464_v8  ;;  %v961_v38 = vadd.f32 %v960_v30, %v464_v8  ;;  %v479_v6 = vpop.permute.xlu1 %478 }
 0x1a3   : > { %v1355_v31 = vmin.f32 %v1323_v20, %v1138_v15  ;;  %v1292_v32 = vmin.f32 %v1260_v21, %v1140_v16  ;;  %v1143_v33 = vadd.f32 %v2972_v12, %v702_v23  ;;  %v1145_v41 = vadd.f32 %v2976_v18, %v959_v29  ;;  %v1232_v20 = vld [vmem:[#allocation2 + $0x88] sm:$0xff] }
 0x1a4   : > { %v1144_v36 = vadd.f32 %v2974_v14, %v704_v27  ;;  %v707_v37 = vpop.f32.mrb[30].mxu0  ;;  %v964_v44 = vpop.f32.mrb[30].mxu1  ;;  %v1146_v53 = vadd.f32 %v2980_v28, %v961_v38  ;;  %v1233_v38 = vld [vmem:[#allocation2 + $0x90] sm:$0xff] }
 0x1a5   : > { %1387 = vst [vmem:[#allocation2 + $0x60] sm:$0xff] %v1355_v31  ;;  %v1324_v39 = vmin.f32 %v1292_v32, %v1141_v22  ;;  %v1261_v40 = vmin.f32 %v1229_v26, %v1143_v33  ;;  %v708_v42 = vadd.f32 %v707_v37, %v469_v34  ;;  %v709_v43 = vpop.f32.mrb[31].mxu0  ;;  %v965_v47 = vadd.f32 %v964_v44, %v469_v34  ;;  %v966_v48 = vpop.f32.mrb[31].mxu1 }
 0x1a6   : > { %v710_v46 = vadd.f32 %v709_v43, %v469_v34  ;;  %v967_v55 = vadd.f32 %v966_v48, %v469_v34  ;;  %v484_v27 = vpop.permute.xlu0 %483 }
 0x1a7   : > { %v1356_v49 = vmin.f32 %v1324_v39, %v1142_v35  ;;  %v1293_v50 = vmin.f32 %v1261_v40, %v1144_v36  ;;  %v1147_v51 = vadd.f32 %v2972_v12, %v708_v42  ;;  %v1149_v59 = vadd.f32 %v2976_v18, %v965_v47 }
 0x1a8   : > { %v1148_v54 = vadd.f32 %v2974_v14, %v710_v46  ;;  %v713_v56 = vpop.f32.mrb[32].mxu0  ;;  %v970_v61 = vpop.f32.mrb[32].mxu1  ;;  %v1150_v7 = vadd.f32 %v2980_v28, %v967_v55 }
 0x1a9   : > { %1388 = vst [vmem:[#allocation2 + $0x68] sm:$0xff] %v1356_v49  ;;  %v1325_v57 = vmin.f32 %v1293_v50, %v1145_v41  ;;  %v1262_v58 = vmin.f32 %v1230_v45, %v1147_v51  ;;  %v714_v60 = vadd.f32 %v713_v56, %v474_v52  ;;  %v715_v62 = vpop.f32.mrb[33].mxu0  ;;  %v971_v0 = vadd.f32 %v970_v61, %v474_v52  ;;  %v972_v2 = vpop.f32.mrb[33].mxu1 }
 0x1aa   : > { %v716_v1 = vadd.f32 %v715_v62, %v474_v52  ;;  %v973_v8 = vadd.f32 %v972_v2, %v474_v52  ;;  %v489_v46 = vpop.permute.xlu1 %488 }
 0x1ab   : > { %v1357_v3 = vmin.f32 %v1325_v57, %v1146_v53  ;;  %v1294_v4 = vmin.f32 %v1262_v58, %v1148_v54  ;;  %v1151_v5 = vadd.f32 %v2972_v12, %v714_v60  ;;  %v1153_v19 = vadd.f32 %v2976_v18, %v971_v0  ;;  %v1234_v57 = vld [vmem:[#allocation2 + $0x98] sm:$0xff]  ;;  %v494_v0 = vpop.permute.xlu0 %493 }
 0x1ac   : > { %v1152_v9 = vadd.f32 %v2974_v14, %v716_v1  ;;  %v719_v10 = vpop.f32.mrb[34].mxu0  ;;  %v976_v16 = vpop.f32.mrb[34].mxu1  ;;  %v1154_v32 = vadd.f32 %v2980_v28, %v973_v8 }
 0x1ad   : > { %1389 = vst [vmem:[#allocation2 + $0x70] sm:$0xff] %v1357_v3  ;;  %v1326_v11 = vmin.f32 %v1294_v4, %v1149_v59  ;;  %v1263_v13 = vmin.f32 %v1231_v63, %v1151_v5  ;;  %v720_v15 = vadd.f32 %v719_v10, %v479_v6  ;;  %v721_v17 = vpop.f32.mrb[35].mxu0  ;;  %v978_v22 = vpop.f32.mrb[35].mxu1  ;;  %v977_v26 = vadd.f32 %v976_v16, %v479_v6 }
 0x1ae   : > { %v722_v21 = vadd.f32 %v721_v17, %v479_v6  ;;  %v979_v30 = vadd.f32 %v978_v22, %v479_v6 }
 0x1af   : > { %v1358_v23 = vmin.f32 %v1326_v11, %v1150_v7  ;;  %v1295_v24 = vmin.f32 %v1263_v13, %v1152_v9  ;;  %v1155_v25 = vadd.f32 %v2972_v12, %v720_v15  ;;  %v1157_v43 = vadd.f32 %v2976_v18, %v977_v26  ;;  %v1235_v11 = vld [vmem:[#allocation2 + $0xa0] sm:$0xff] }
 0x1b0   : > { %v1156_v29 = vadd.f32 %v2974_v14, %v722_v21  ;;  %v725_v31 = vpop.f32.mrb[36].mxu0  ;;  %v982_v36 = vpop.f32.mrb[36].mxu1  ;;  %v1158_v47 = vadd.f32 %v2980_v28, %v979_v30 }
 0x1b1   : > { %1390 = vst [vmem:[#allocation2 + $0x78] sm:$0xff] %v1358_v23  ;;  %v1327_v33 = vmin.f32 %v1295_v24, %v1153_v19  ;;  %v1264_v34 = vmin.f32 %v1232_v20, %v1155_v25  ;;  %v726_v35 = vadd.f32 %v725_v31, %v484_v27  ;;  %v727_v37 = vpop.f32.mrb[37].mxu0  ;;  %v983_v39 = vadd.f32 %v982_v36, %v484_v27  ;;  %v984_v41 = vpop.f32.mrb[37].mxu1 }
 0x1b2   : > { %v728_v40 = vadd.f32 %v727_v37, %v484_v27  ;;  %v985_v52 = vadd.f32 %v984_v41, %v484_v27  ;;  %v499_v21 = vpop.permute.xlu1 %498 }
 0x1b3   : > { %v1359_v42 = vmin.f32 %v1327_v33, %v1154_v32  ;;  %v1296_v44 = vmin.f32 %v1264_v34, %v1156_v29  ;;  %v1159_v45 = vadd.f32 %v2972_v12, %v726_v35  ;;  %v1161_v56 = vadd.f32 %v2976_v18, %v983_v39  ;;  %v1236_v33 = vld [vmem:[#allocation2 + $0xa8] sm:$0xff] }
 0x1b4   : > { %v1160_v48 = vadd.f32 %v2974_v14, %v728_v40  ;;  %v731_v49 = vpop.f32.mrb[38].mxu0  ;;  %v988_v54 = vpop.f32.mrb[38].mxu1  ;;  %v1162_v4 = vadd.f32 %v2980_v28, %v985_v52 }
 0x1b5   : > { %1391 = vst [vmem:[#allocation2 + $0x80] sm:$0xff] %v1359_v42  ;;  %v1328_v50 = vmin.f32 %v1296_v44, %v1157_v43  ;;  %v1265_v51 = vmin.f32 %v1233_v38, %v1159_v45  ;;  %v732_v53 = vadd.f32 %v731_v49, %v489_v46  ;;  %v733_v55 = vpop.f32.mrb[39].mxu0  ;;  %v990_v59 = vpop.f32.mrb[39].mxu1  ;;  %v989_v63 = vadd.f32 %v988_v54, %v489_v46 }
 0x1b6   : > { %v734_v58 = vadd.f32 %v733_v55, %v489_v46  ;;  %v991_v2 = vadd.f32 %v990_v59, %v489_v46  ;;  %v504_v40 = vpop.permute.xlu0 %503 }
 0x1b7   : > { %v1360_v60 = vmin.f32 %v1328_v50, %v1158_v47  ;;  %v1297_v61 = vmin.f32 %v1265_v51, %v1160_v48  ;;  %v1163_v62 = vadd.f32 %v2972_v12, %v732_v53  ;;  %v1165_v17 = vadd.f32 %v2976_v18, %v989_v63  ;;  %v1237_v50 = vld [vmem:[#allocation2 + $0xb0] sm:$0xff] }
 0x1b8   : > { %v1164_v1 = vadd.f32 %v2974_v14, %v734_v58  ;;  %v737_v3 = vpop.f32.mrb[40].mxu0  ;;  %v994_v9 = vpop.f32.mrb[40].mxu1  ;;  %v1166_v22 = vadd.f32 %v2980_v28, %v991_v2 }
 0x1b9   : > { %1392 = vst [vmem:[#allocation2 + $0x88] sm:$0xff] %v1360_v60  ;;  %v1329_v5 = vmin.f32 %v1297_v61, %v1161_v56  ;;  %v1266_v6 = vmin.f32 %v1234_v57, %v1163_v62  ;;  %v738_v7 = vadd.f32 %v737_v3, %v494_v0  ;;  %v739_v10 = vpop.f32.mrb[41].mxu0  ;;  %v995_v13 = vadd.f32 %v994_v9, %v494_v0  ;;  %v996_v15 = vpop.f32.mrb[41].mxu1 }
 0x1ba   : > { %v740_v8 = vadd.f32 %v739_v10, %v494_v0  ;;  %v997_v27 = vadd.f32 %v996_v15, %v494_v0  ;;  %v509_v58 = vpop.permute.xlu1 %508 }
 0x1bb   : > { %v1361_v16 = vmin.f32 %v1329_v5, %v1162_v4  ;;  %v1298_v19 = vmin.f32 %v1266_v6, %v1164_v1  ;;  %v1167_v20 = vadd.f32 %v2972_v12, %v738_v7  ;;  %v1169_v32 = vadd.f32 %v2976_v18, %v995_v13  ;;  %v1238_v5 = vld [vmem:[#allocation2 + $0xb8] sm:$0xff] }
 0x1bc   : > { %v1168_v23 = vadd.f32 %v2974_v14, %v740_v8  ;;  %v743_v24 = vpop.f32.mrb[42].mxu0  ;;  %v1000_v30 = vpop.f32.mrb[42].mxu1  ;;  %v1170_v44 = vadd.f32 %v2980_v28, %v997_v27 }
 0x1bd   : > { %1393 = vst [vmem:[#allocation2 + $0x90] sm:$0xff] %v1361_v16  ;;  %v1330_v25 = vmin.f32 %v1298_v19, %v1165_v17  ;;  %v1267_v26 = vmin.f32 %v1235_v11, %v1167_v20  ;;  %v744_v29 = vadd.f32 %v743_v24, %v499_v21  ;;  %v745_v31 = vpop.f32.mrb[43].mxu0  ;;  %v1002_v35 = vpop.f32.mrb[43].mxu1  ;;  %v1001_v39 = vadd.f32 %v1000_v30, %v499_v21 }
 0x1be   : > { %v746_v34 = vadd.f32 %v745_v31, %v499_v21  ;;  %v1003_v42 = vadd.f32 %v1002_v35, %v499_v21  ;;  %v514_v8 = vpop.permute.xlu0 %513 }
 0x1bf   : > { %v1362_v36 = vmin.f32 %v1330_v25, %v1166_v22  ;;  %v1299_v37 = vmin.f32 %v1267_v26, %v1168_v23  ;;  %v1171_v38 = vadd.f32 %v2972_v12, %v744_v29  ;;  %v1173_v55 = vadd.f32 %v2976_v18, %v1001_v39  ;;  %v1239_v25 = vld [vmem:[#allocation2 + $0xc0] sm:$0xff] }
 0x1c0   : > { %v1172_v41 = vadd.f32 %v2974_v14, %v746_v34  ;;  %v749_v43 = vpop.f32.mrb[44].mxu0  ;;  %v1006_v48 = vpop.f32.mrb[44].mxu1  ;;  %v1174_v59 = vadd.f32 %v2980_v28, %v1003_v42 }
 0x1c1   : > { %1394 = vst [vmem:[#allocation2 + $0x98] sm:$0xff] %v1362_v36  ;;  %v1331_v45 = vmin.f32 %v1299_v37, %v1169_v32  ;;  %v1268_v46 = vmin.f32 %v1236_v33, %v1171_v38  ;;  %v750_v47 = vadd.f32 %v749_v43, %v504_v40  ;;  %v751_v49 = vpop.f32.mrb[45].mxu0  ;;  %v1007_v51 = vadd.f32 %v1006_v48, %v504_v40  ;;  %v1008_v53 = vpop.f32.mrb[45].mxu1 }
 0x1c2   : > { %v752_v52 = vadd.f32 %v751_v49, %v504_v40  ;;  %v1009_v0 = vadd.f32 %v1008_v53, %v504_v40  ;;  %v519_v34 = vpop.permute.xlu1 %518 }
 0x1c3   : > { %v1363_v54 = vmin.f32 %v1331_v45, %v1170_v44  ;;  %v1300_v56 = vmin.f32 %v1268_v46, %v1172_v41  ;;  %v1175_v57 = vadd.f32 %v2972_v12, %v750_v47  ;;  %v1177_v4 = vadd.f32 %v2976_v18, %v1007_v51  ;;  %v1240_v45 = vld [vmem:[#allocation2 + $0xc8] sm:$0xff] }
 0x1c4   : > { %v1176_v60 = vadd.f32 %v2974_v14, %v752_v52  ;;  %v755_v61 = vpop.f32.mrb[46].mxu0  ;;  %v1012_v2 = vpop.f32.mrb[46].mxu1  ;;  %v1178_v19 = vadd.f32 %v2980_v28, %v1009_v0 }
 0x1c5   : > { %1395 = vst [vmem:[#allocation2 + $0xa0] sm:$0xff] %v1363_v54  ;;  %v1332_v62 = vmin.f32 %v1300_v56, %v1173_v55  ;;  %v1269_v63 = vmin.f32 %v1237_v50, %v1175_v57  ;;  %v756_v1 = vadd.f32 %v755_v61, %v509_v58  ;;  %v757_v3 = vpop.f32.mrb[47].mxu0  ;;  %v1014_v7 = vpop.f32.mrb[47].mxu1  ;;  %v1013_v13 = vadd.f32 %v1012_v2, %v509_v58 }
 0x1c6   : > { %v758_v6 = vadd.f32 %v757_v3, %v509_v58  ;;  %v1015_v16 = vadd.f32 %v1014_v7, %v509_v58  ;;  %v524_v52 = vpop.permute.xlu0 %523 }
 0x1c7   : > { %v1364_v9 = vmin.f32 %v1332_v62, %v1174_v59  ;;  %v1301_v10 = vmin.f32 %v1269_v63, %v1176_v60  ;;  %v1179_v11 = vadd.f32 %v2972_v12, %v756_v1  ;;  %v1181_v31 = vadd.f32 %v2976_v18, %v1013_v13  ;;  %v1241_v62 = vld [vmem:[#allocation2 + $0xd0] sm:$0xff] }
 0x1c8   : > { %v1180_v15 = vadd.f32 %v2974_v14, %v758_v6  ;;  %v761_v17 = vpop.f32.mrb[48].mxu0  ;;  %v1018_v23 = vpop.f32.mrb[48].mxu1  ;;  %v1182_v35 = vadd.f32 %v2980_v28, %v1015_v16 }
 0x1c9   : > { %1396 = vst [vmem:[#allocation2 + $0xa8] sm:$0xff] %v1364_v9  ;;  %v1333_v20 = vmin.f32 %v1301_v10, %v1177_v4  ;;  %v1270_v21 = vmin.f32 %v1238_v5, %v1179_v11  ;;  %v762_v22 = vadd.f32 %v761_v17, %v514_v8  ;;  %v763_v24 = vpop.f32.mrb[49].mxu0  ;;  %v1019_v26 = vadd.f32 %v1018_v23, %v514_v8  ;;  %v1020_v29 = vpop.f32.mrb[49].mxu1 }
 0x1ca   : > { %v764_v27 = vadd.f32 %v763_v24, %v514_v8  ;;  %v1021_v40 = vadd.f32 %v1020_v29, %v514_v8  ;;  %v529_v6 = vpop.permute.xlu1 %528 }
 0x1cb   : > { %v1365_v30 = vmin.f32 %v1333_v20, %v1178_v19  ;;  %v1302_v32 = vmin.f32 %v1270_v21, %v1180_v15  ;;  %v1183_v33 = vadd.f32 %v2972_v12, %v762_v22  ;;  %v1185_v44 = vadd.f32 %v2976_v18, %v1019_v26  ;;  %v1242_v20 = vld [vmem:[#allocation2 + $0xd8] sm:$0xff] }
 0x1cc   : > { %v1184_v36 = vadd.f32 %v2974_v14, %v764_v27  ;;  %v767_v37 = vpop.f32.mrb[50].mxu0  ;;  %v1024_v42 = vpop.f32.mrb[50].mxu1  ;;  %v1186_v56 = vadd.f32 %v2980_v28, %v1021_v40 }
 0x1cd   : > { %1397 = vst [vmem:[#allocation2 + $0xb0] sm:$0xff] %v1365_v30  ;;  %v1334_v38 = vmin.f32 %v1302_v32, %v1181_v31  ;;  %v1271_v39 = vmin.f32 %v1239_v25, %v1183_v33  ;;  %v768_v41 = vadd.f32 %v767_v37, %v519_v34  ;;  %v769_v43 = vpop.f32.mrb[51].mxu0  ;;  %v1026_v47 = vpop.f32.mrb[51].mxu1  ;;  %v1025_v51 = vadd.f32 %v1024_v42, %v519_v34 }
 0x1ce   : > { %v770_v46 = vadd.f32 %v769_v43, %v519_v34  ;;  %v1027_v54 = vadd.f32 %v1026_v47, %v519_v34  ;;  %v534_v27 = vpop.permute.xlu0 %533 }
 0x1cf   : > { %v1366_v48 = vmin.f32 %v1334_v38, %v1182_v35  ;;  %v1303_v49 = vmin.f32 %v1271_v39, %v1184_v36  ;;  %v1187_v50 = vadd.f32 %v2972_v12, %v768_v41  ;;  %v1189_v3 = vadd.f32 %v2976_v18, %v1025_v51  ;;  %v1243_v38 = vld [vmem:[#allocation2 + $0xe0] sm:$0xff] }
 0x1d0   : > { %v1188_v53 = vadd.f32 %v2974_v14, %v770_v46  ;;  %v773_v55 = vpop.f32.mrb[52].mxu0  ;;  %v1030_v60 = vpop.f32.mrb[52].mxu1  ;;  %v1190_v7 = vadd.f32 %v2980_v28, %v1027_v54 }
 0x1d1   : > { %1398 = vst [vmem:[#allocation2 + $0xb8] sm:$0xff] %v1366_v48  ;;  %v1335_v57 = vmin.f32 %v1303_v49, %v1185_v44  ;;  %v1272_v58 = vmin.f32 %v1240_v45, %v1187_v50  ;;  %v774_v59 = vadd.f32 %v773_v55, %v524_v52  ;;  %v775_v61 = vpop.f32.mrb[53].mxu0  ;;  %v1031_v63 = vadd.f32 %v1030_v60, %v524_v52  ;;  %v1032_v1 = vpop.f32.mrb[53].mxu1 }
 0x1d2   : > { %v776_v0 = vadd.f32 %v775_v61, %v524_v52  ;;  %v1033_v8 = vadd.f32 %v1032_v1, %v524_v52  ;;  %v539_v46 = vpop.permute.xlu1 %538 }
 0x1d3   : > { %v1367_v2 = vmin.f32 %v1335_v57, %v1186_v56  ;;  %v1304_v4 = vmin.f32 %v1272_v58, %v1188_v53  ;;  %v1191_v5 = vadd.f32 %v2972_v12, %v774_v59  ;;  %v1193_v19 = vadd.f32 %v2976_v18, %v1031_v63  ;;  %v1244_v57 = vld [vmem:[#allocation2 + $0xe8] sm:$0xff] }
 0x1d4   : > { %v1192_v9 = vadd.f32 %v2974_v14, %v776_v0  ;;  %v779_v10 = vpop.f32.mrb[54].mxu0  ;;  %v1036_v16 = vpop.f32.mrb[54].mxu1  ;;  %v1194_v32 = vadd.f32 %v2980_v28, %v1033_v8 }
 0x1d5   : > { %1399 = vst [vmem:[#allocation2 + $0xc0] sm:$0xff] %v1367_v2  ;;  %v1336_v11 = vmin.f32 %v1304_v4, %v1189_v3  ;;  %v1273_v13 = vmin.f32 %v1241_v62, %v1191_v5  ;;  %v780_v15 = vadd.f32 %v779_v10, %v529_v6  ;;  %v781_v17 = vpop.f32.mrb[55].mxu0  ;;  %v1038_v22 = vpop.f32.mrb[55].mxu1  ;;  %v1037_v26 = vadd.f32 %v1036_v16, %v529_v6 }
 0x1d6   : > { %v782_v21 = vadd.f32 %v781_v17, %v529_v6  ;;  %v1039_v30 = vadd.f32 %v1038_v22, %v529_v6  ;;  %v544_v0 = vpop.permute.xlu0 %543 }
 0x1d7   : > { %v1368_v23 = vmin.f32 %v1336_v11, %v1190_v7  ;;  %v1305_v24 = vmin.f32 %v1273_v13, %v1192_v9  ;;  %v1195_v25 = vadd.f32 %v2972_v12, %v780_v15  ;;  %v1197_v43 = vadd.f32 %v2976_v18, %v1037_v26  ;;  %v1245_v11 = vld [vmem:[#allocation2 + $0xf0] sm:$0xff] }
 0x1d8   : > { %v1196_v29 = vadd.f32 %v2974_v14, %v782_v21  ;;  %v785_v31 = vpop.f32.mrb[56].mxu0  ;;  %v1042_v36 = vpop.f32.mrb[56].mxu1  ;;  %v1198_v47 = vadd.f32 %v2980_v28, %v1039_v30 }
 0x1d9   : > { %1400 = vst [vmem:[#allocation2 + $0xc8] sm:$0xff] %v1368_v23  ;;  %v1337_v33 = vmin.f32 %v1305_v24, %v1193_v19  ;;  %v1274_v34 = vmin.f32 %v1242_v20, %v1195_v25  ;;  %v786_v35 = vadd.f32 %v785_v31, %v534_v27  ;;  %v787_v37 = vpop.f32.mrb[57].mxu0  ;;  %v1043_v39 = vadd.f32 %v1042_v36, %v534_v27  ;;  %v1044_v41 = vpop.f32.mrb[57].mxu1 }
 0x1da   : > { %v788_v40 = vadd.f32 %v787_v37, %v534_v27  ;;  %v1045_v52 = vadd.f32 %v1044_v41, %v534_v27  ;;  %v549_v21 = vpop.permute.xlu1 %548 }
 0x1db   : > { %v1369_v42 = vmin.f32 %v1337_v33, %v1194_v32  ;;  %v1306_v44 = vmin.f32 %v1274_v34, %v1196_v29  ;;  %v1199_v45 = vadd.f32 %v2972_v12, %v786_v35  ;;  %v1201_v56 = vadd.f32 %v2976_v18, %v1043_v39  ;;  %v1246_v33 = vld [vmem:[#allocation2 + $0xf8] sm:$0xff] }
 0x1dc   : > { %v1200_v48 = vadd.f32 %v2974_v14, %v788_v40  ;;  %v791_v49 = vpop.f32.mrb[58].mxu0  ;;  %v1048_v54 = vpop.f32.mrb[58].mxu1  ;;  %v1202_v4 = vadd.f32 %v2980_v28, %v1045_v52 }
 0x1dd   : > { %1401 = vst [vmem:[#allocation2 + $0xd0] sm:$0xff] %v1369_v42  ;;  %v1338_v50 = vmin.f32 %v1306_v44, %v1197_v43  ;;  %v1275_v51 = vmin.f32 %v1243_v38, %v1199_v45  ;;  %v792_v53 = vadd.f32 %v791_v49, %v539_v46  ;;  %v793_v55 = vpop.f32.mrb[59].mxu0  ;;  %v1050_v59 = vpop.f32.mrb[59].mxu1  ;;  %v1049_v63 = vadd.f32 %v1048_v54, %v539_v46 }
 0x1de   : > { %v794_v58 = vadd.f32 %v793_v55, %v539_v46  ;;  %v1051_v2 = vadd.f32 %v1050_v59, %v539_v46 }
 0x1df   : > { %v1370_v60 = vmin.f32 %v1338_v50, %v1198_v47  ;;  %v1307_v61 = vmin.f32 %v1275_v51, %v1200_v48  ;;  %v1203_v62 = vadd.f32 %v2972_v12, %v792_v53  ;;  %v1205_v17 = vadd.f32 %v2976_v18, %v1049_v63 }
 0x1e0   : > { %v1204_v1 = vadd.f32 %v2974_v14, %v794_v58  ;;  %v797_v3 = vpop.f32.mrb[60].mxu0  ;;  %v1054_v9 = vpop.f32.mrb[60].mxu1  ;;  %v1206_v22 = vadd.f32 %v2980_v28, %v1051_v2 }
 0x1e1   : > { %1402 = vst [vmem:[#allocation2 + $0xd8] sm:$0xff] %v1370_v60  ;;  %v1339_v5 = vmin.f32 %v1307_v61, %v1201_v56  ;;  %v1276_v6 = vmin.f32 %v1244_v57, %v1203_v62  ;;  %v798_v7 = vadd.f32 %v797_v3, %v544_v0  ;;  %v799_v10 = vpop.f32.mrb[61].mxu0  ;;  %v1055_v13 = vadd.f32 %v1054_v9, %v544_v0  ;;  %v1056_v15 = vpop.f32.mrb[61].mxu1 }
 0x1e2   : > { %v800_v8 = vadd.f32 %v799_v10, %v544_v0  ;;  %v1057_v27 = vadd.f32 %v1056_v15, %v544_v0 }
 0x1e3   : > { %v1371_v16 = vmin.f32 %v1339_v5, %v1202_v4  ;;  %v1308_v19 = vmin.f32 %v1276_v6, %v1204_v1  ;;  %v1207_v20 = vadd.f32 %v2972_v12, %v798_v7  ;;  %v1209_v32 = vadd.f32 %v2976_v18, %v1055_v13 }
 0x1e4   : > { %v1208_v23 = vadd.f32 %v2974_v14, %v800_v8  ;;  %v803_v24 = vpop.f32.mrb[62].mxu0  ;;  %v1060_v30 = vpop.f32.mrb[62].mxu1  ;;  %v1210_v41 = vadd.f32 %v2980_v28, %v1057_v27 }
 0x1e5   : > { %1403 = vst [vmem:[#allocation2 + $0xe0] sm:$0xff] %v1371_v16  ;;  %v1340_v25 = vmin.f32 %v1308_v19, %v1205_v17  ;;  %v1277_v26 = vmin.f32 %v1245_v11, %v1207_v20  ;;  %v804_v29 = vadd.f32 %v803_v24, %v549_v21  ;;  %v805_v31 = vpop.f32.mrb[63].mxu0  ;;  %v1062_v35 = vpop.f32.mrb[63].mxu1  ;;  %v1061_v39 = vadd.f32 %v1060_v30, %v549_v21 }
 0x1e6   : > { %v806_v34 = vadd.f32 %v805_v31, %v549_v21  ;;  %v1063_v44 = vadd.f32 %v1062_v35, %v549_v21 }
 0x1e7   : > { %v1372_v36 = vmin.f32 %v1340_v25, %v1206_v22  ;;  %v1309_v37 = vmin.f32 %v1277_v26, %v1208_v23  ;;  %v1211_v38 = vadd.f32 %v2972_v12, %v804_v29  ;;  %v1213_v46 = vadd.f32 %v2976_v18, %v1061_v39 }
 0x1e8   : > { %v1212_v40 = vadd.f32 %v2974_v14, %v806_v34  ;;  %v1214_v48 = vadd.f32 %v2980_v28, %v1063_v44 }
 0x1e9   : > { %1404 = vst [vmem:[#allocation2 + $0xe8] sm:$0xff] %v1372_v36  ;;  %v1341_v42 = vmin.f32 %v1309_v37, %v1209_v32  ;;  %v1278_v43 = vmin.f32 %v1246_v33, %v1211_v38 }
 0x1eb   : > { %v1373_v45 = vmin.f32 %v1341_v42, %v1210_v41  ;;  %v1310_v47 = vmin.f32 %v1278_v43, %v1212_v40 }
 0x1ed   : > { %1405 = vst [vmem:[#allocation2 + $0xf0] sm:$0xff] %v1373_v45  ;;  %v1342_v49 = vmin.f32 %v1310_v47, %v1213_v46 }
 0x1ef   : > { %v1374_v50 = vmin.f32 %v1342_v49, %v1214_v48 }
 0x1f1   : > { %1406 = vst [vmem:[#allocation2 + $0xf8] sm:$0xff] %v1374_v50 }
 0x1f2 PF: > { %v1412_v12 = vld [vmem:[#allocation2 + $0x10] sm:$0xff]  ;;  %v1410_v51 = vld [vmem:[#allocation2] sm:$0xff]  ;;  %v1413_v14 = vld [vmem:[#allocation2 + $0x18] sm:$0xff]  ;;  %s2545_s0 = smov 125   ;;  %s2159_s12 = sshll.u32 %s2525_s28, 4 }
 0x1f3   : > { %1446 = vmin.xlane.f32.xlu1 %v1412_v12  ;;  %1442 = vmin.xlane.f32.xlu0 %v1410_v51  ;;  %v1411_v52 = vld [vmem:[#allocation2 + $0x8] sm:$0xff]  ;;  %v1414_v54 = vld [vmem:[#allocation2 + $0x20] sm:$0xff]  ;;  %v1417_v18 = vld [vmem:[#allocation2 + $0x38] sm:$0xff]  ;;  %s2046_s20 = sshll.u32 %s241_s8, 4  ;;  %s3510_s11 = scalar_lea.hbm %s3565_s4, %s2159_s12  ;;  %s3512_s20 = int_to_ptr.vmem [resolvable:$true] %s2046_s20 }
 0x1f4   : > { %v1415_v53 = vld [vmem:[#allocation2 + $0x28] sm:$0xff]  ;;  %v1416_v55 = vld [vmem:[#allocation2 + $0x30] sm:$0xff]  ;;  %v1418_v56 = vld [vmem:[#allocation2 + $0x40] sm:$0xff]  ;;  %s2034_s15 = scalar_lea.sflag [#allocation7], %s2736_s13  ;;  %s2445_s28 = scalar_lea.vmem %s3512_s20, 16 }
 0x1f5   : > { %v1419_v28 = vld [vmem:[#allocation2 + $0x48] sm:$0xff]  ;;  %v1421_v57 = vld [vmem:[#allocation2 + $0x58] sm:$0xff]  ;;  %v1420_v58 = vld [vmem:[#allocation2 + $0x50] sm:$0xff]  ;;  %p2446_p1 = scmp.ne.s32.totalorder %s3512_s20, %s2445_s28  ;;  %s2546_s17 = smov [#allocation10]  }
 0x1f6   : > { %v1423_v59 = vld [vmem:[#allocation2 + $0x68] sm:$0xff]  ;;  %v1422_v60 = vld [vmem:[#allocation2 + $0x60] sm:$0xff]  ;;  %v1425_v61 = vld [vmem:[#allocation2 + $0x78] sm:$0xff] }
 0x1f7   : > { %1448 = vmin.xlane.f32.xlu1 %v1413_v14  ;;  %1444 = vmin.xlane.f32.xlu0 %v1411_v52  ;;  %v1424_v62 = vld [vmem:[#allocation2 + $0x70] sm:$0xff]  ;;  %v1427_v63 = vld [vmem:[#allocation2 + $0x88] sm:$0xff]  ;;  %v1426_v0 = vld [vmem:[#allocation2 + $0x80] sm:$0xff]  ;;  %p2447_p0 = pnand %p2446_p1, %p2680_p13 }
 0x1f8   : > { %v1429_v1 = vld [vmem:[#allocation2 + $0x98] sm:$0xff]  ;;  %v1428_v2 = vld [vmem:[#allocation2 + $0x90] sm:$0xff]  ;;  %v1431_v3 = vld [vmem:[#allocation2 + $0xa8] sm:$0xff] }
 0x1f9   : > { %v1430_v4 = vld [vmem:[#allocation2 + $0xa0] sm:$0xff]  ;;  %v1433_v5 = vld [vmem:[#allocation2 + $0xb8] sm:$0xff]  ;;  %v1432_v6 = vld [vmem:[#allocation2 + $0xb0] sm:$0xff]  ;;  %p2448_p3 = pneg %p2447_p0 }
 0x1fa   : > { %v1435_v7 = vld [vmem:[#allocation2 + $0xc8] sm:$0xff]  ;;  %v1434_v9 = vld [vmem:[#allocation2 + $0xc0] sm:$0xff]  ;;  %v1437_v10 = vld [vmem:[#allocation2 + $0xd8] sm:$0xff] }
 0x1fb   : > { %1452 = vmin.xlane.f32.xlu1 %v1415_v53  ;;  %1450 = vmin.xlane.f32.xlu0 %v1414_v54  ;;  %v1436_v11 = vld [vmem:[#allocation2 + $0xd0] sm:$0xff]  ;;  %v1439_v13 = vld [vmem:[#allocation2 + $0xe8] sm:$0xff]  ;;  %v1438_v8 = vld [vmem:[#allocation2 + $0xe0] sm:$0xff] }
 0x1fc   : > { %v1441_v15 = vld [vmem:[#allocation2 + $0xf8] sm:$0xff]  ;;  %v1440_v16 = vld [vmem:[#allocation2 + $0xf0] sm:$0xff]  ;;  %v1762_v44 = vld [vmem:[%s2740_s19] sm:$0xff] }
 0x1ff   : > { %1456 = vmin.xlane.f32.xlu1 %v1417_v18  ;;  %1454 = vmin.xlane.f32.xlu0 %v1416_v55  ;;  %v1764_v55 = vld [vmem:[%s2740_s19 + $0x10] sm:$0xff] }
 0x203   : > { %1460 = vmin.xlane.f32.xlu1 %v1419_v28  ;;  %1458 = vmin.xlane.f32.xlu0 %v1418_v56 }
 0x207   : > { %1464 = vmin.xlane.f32.xlu1 %v1421_v57  ;;  %1462 = vmin.xlane.f32.xlu0 %v1420_v58  ;;  %v1763_v57 = vld [vmem:[%s2740_s19 + $0x8] sm:$0xff] }
 0x20b   : > { %1468 = vmin.xlane.f32.xlu1 %v1423_v59  ;;  %1466 = vmin.xlane.f32.xlu0 %v1422_v60 }
 0x20f   : > { %1472 = vmin.xlane.f32.xlu1 %v1425_v61  ;;  %1470 = vmin.xlane.f32.xlu0 %v1424_v62 }
 0x213   : > { %1476 = vmin.xlane.f32.xlu1 %v1427_v63  ;;  %1474 = vmin.xlane.f32.xlu0 %v1426_v0 }
 0x217   : > { %1480 = vmin.xlane.f32.xlu1 %v1429_v1  ;;  %1478 = vmin.xlane.f32.xlu0 %v1428_v2 }
 0x21b   : > { %1484 = vmin.xlane.f32.xlu1 %v1431_v3  ;;  %1482 = vmin.xlane.f32.xlu0 %v1430_v4 }
 0x21f   : > { %1488 = vmin.xlane.f32.xlu1 %v1433_v5  ;;  %1486 = vmin.xlane.f32.xlu0 %v1432_v6 }
 0x223   : > { %1492 = vmin.xlane.f32.xlu1 %v1435_v7  ;;  %1490 = vmin.xlane.f32.xlu0 %v1434_v9  ;;  %v1765_v9 = vld [vmem:[%s2740_s19 + $0x18] sm:$0xff] }
 0x227   : > { %1496 = vmin.xlane.f32.xlu1 %v1437_v10  ;;  %1494 = vmin.xlane.f32.xlu0 %v1436_v11 }
 0x22b   : > { %1500 = vmin.xlane.f32.xlu1 %v1439_v13  ;;  %1498 = vmin.xlane.f32.xlu0 %v1438_v8  ;;  %v1766_v13 = vld [vmem:[%s2740_s19 + $0x20] sm:$0xff] }
 0x22f   : > { %1504 = vmin.xlane.f32.xlu1 %v1441_v15  ;;  %1502 = vmin.xlane.f32.xlu0 %v1440_v16 }
 0x280   : > { %v1447_v17 = vpop.xlane.xlu1 %1446  ;;  %v1443_v19 = vpop.xlane.xlu0 %1442 }
 0x281   : > { %v1508_v20 = vmax.f32 %v1447_v17, 0.0  ;;  %v1506_v21 = vmax.f32 %v1443_v19, 0.0 }
 0x283   : > { %2313 = vrsqrt.f32 %v1508_v20  ;;  %vm1540_vm0 = vcmp.eq.f32.partialorder %v1506_v21, inf  ;;  %vm1542_vm1 = vcmp.eq.f32.partialorder %v1506_v21, 0.0  ;;  %v1543_v33 = vand.u32 2147483648, %v1506_v21 }
 0x284   : > { %2315 = vrsqrt.f32 %v1506_v21  ;;  %v1449_v22 = vpop.xlane.xlu1 %1448  ;;  %v1445_v23 = vpop.xlane.xlu0 %1444  ;;  %vm1554_vm2 = vcmp.eq.f32.partialorder %v1508_v20, inf  ;;  %vm1556_vm3 = vcmp.eq.f32.partialorder %v1508_v20, 0.0  ;;  %v1557_v37 = vand.u32 2147483648, %v1508_v20 }
 0x285   : > { %v3108_v24 = vmax.f32 %v1449_v22, 0.0  ;;  %v3110_v25 = vmax.f32 %v1445_v23, 0.0 }
 0x287   : > { %2317 = vrsqrt.f32 %v3108_v24  ;;  %vm1547_vm4 = vcmp.eq.f32.partialorder %v3110_v25, inf  ;;  %vm1549_vm5 = vcmp.eq.f32.partialorder %v3110_v25, 0.0  ;;  %v1550_v39 = vand.u32 2147483648, %v3110_v25 }
 0x288   : > { %2319 = vrsqrt.f32 %v3110_v25  ;;  %v1453_v26 = vpop.xlane.xlu1 %1452  ;;  %v1451_v27 = vpop.xlane.xlu0 %1450  ;;  %vm1561_vm6 = vcmp.eq.f32.partialorder %v3108_v24, inf  ;;  %vm1563_vm7 = vcmp.eq.f32.partialorder %v3108_v24, 0.0  ;;  %v1564_v46 = vand.u32 2147483648, %v3108_v24 }
 0x289   : > { %v3114_v29 = vmax.f32 %v1453_v26, 0.0  ;;  %v3116_v30 = vmax.f32 %v1451_v27, 0.0 }
 0x28b   : > { %2321 = vrsqrt.f32 %v3114_v29  ;;  %vm1568_vm8 = vcmp.eq.f32.partialorder %v3116_v30, inf  ;;  %vm1570_vm9 = vcmp.eq.f32.partialorder %v3116_v30, 0.0  ;;  %v1571_v12 = vand.u32 2147483648, %v3116_v30 }
 0x28c   : > { %2323 = vrsqrt.f32 %v3116_v30  ;;  %v1457_v31 = vpop.xlane.xlu1 %1456  ;;  %v1455_v32 = vpop.xlane.xlu0 %1454  ;;  %vm1575_vm10 = vcmp.eq.f32.partialorder %v3114_v29, inf  ;;  %vm1577_vm11 = vcmp.eq.f32.partialorder %v3114_v29, 0.0  ;;  %v1578_v59 = vand.u32 2147483648, %v3114_v29 }
 0x28d   : > { %v2314_v34 = vpop.eup %2313  ;;  %v3120_v35 = vmax.f32 %v1457_v31, 0.0  ;;  %v3122_v36 = vmax.f32 %v1455_v32, 0.0 }
 0x28e   : > { %v2316_v38 = vpop.eup %2315  ;;  %v1553_v40 = vmul.f32 %v2314_v34, %v1508_v20  ;;  %v1768_v34 = vld [vmem:[%s2740_s19 + $0x30] sm:$0xff] }
 0x28f   : > { %2325 = vrsqrt.f32 %v3120_v35  ;;  %v1539_v41 = vmul.f32 %v2316_v38, %v1506_v21  ;;  %vm1582_vm12 = vcmp.eq.f32.partialorder %v3122_v36, inf  ;;  %vm1584_vm13 = vcmp.eq.f32.partialorder %v3122_v36, 0.0 }
 0x290   : > { %2327 = vrsqrt.f32 %v3122_v36  ;;  %v1461_v42 = vpop.xlane.xlu1 %1460  ;;  %v1459_v43 = vpop.xlane.xlu0 %1458  ;;  %v1555_v45 = vsel %vm1554_vm2, %v1508_v20, %v1553_v40  ;;  %v1585_v0 = vand.u32 2147483648, %v3122_v36  ;;  %vm1589_vm14 = vcmp.eq.f32.partialorder %v3120_v35, inf }
 0x291   : > { %v2318_v47 = vpop.eup %2317  ;;  %v3135_v48 = vmax.f32 %v1461_v42, 0.0  ;;  %v3137_v49 = vmax.f32 %v1459_v43, 0.0  ;;  %v1541_v50 = vsel %vm1540_vm0, %v1506_v21, %v1539_v41  ;;  %v1558_v18 = vsel %vm1556_vm3, %v1557_v37, %v1555_v45  ;;  %v1767_v21 = vld [vmem:[%s2740_s19 + $0x28] sm:$0xff] }
 0x292   : > { %v2320_v51 = vpop.eup %2319  ;;  %v1544_v14 = vsel %vm1542_vm1, %v1543_v33, %v1541_v50  ;;  %v1560_v52 = vmul.f32 %v2318_v47, %v3108_v24  ;;  %v1796_v3 = vmul.f32 %v1764_v55, %v1558_v18  ;;  %vm1591_vm0 = vcmp.eq.f32.partialorder %v3120_v35, 0.0 }
 0x293   : > { %2329 = vrsqrt.f32 %v3135_v48  ;;  %v1794_v53 = vmul.f32 %v1762_v44, %v1544_v14  ;;  %v1546_v54 = vmul.f32 %v2320_v51, %v3110_v25  ;;  %vm1596_vm15 = vcmp.eq.f32.partialorder %v3137_v49, inf  ;;  %v1769_v44 = vld [vmem:[%s2740_s19 + $0x38] sm:$0xff] }
 0x294   : > { %2331 = vrsqrt.f32 %v3137_v49  ;;  %v1465_v28 = vpop.xlane.xlu1 %1464  ;;  %v1463_v56 = vpop.xlane.xlu0 %1462  ;;  %v1562_v58 = vsel %vm1561_vm6, %v3108_v24, %v1560_v52  ;;  %vm1598_vm1 = vcmp.eq.f32.partialorder %v3137_v49, 0.0  ;;  %v1770_v52 = vld [vmem:[%s2740_s19 + $0x40] sm:$0xff] }
 0x295   : > { %v2322_v60 = vpop.eup %2321  ;;  %v3157_v61 = vmax.f32 %v1465_v28, 0.0  ;;  %1858 = vrot.lane.b32.xlu0 %v1794_v53, %s2545_s0  ;;  %v3160_v62 = vmax.f32 %v1463_v56, 0.0  ;;  %v1548_v63 = vsel %vm1547_vm4, %v3110_v25, %v1546_v54  ;;  %v1565_v7 = vsel %vm1563_vm7, %v1564_v46, %v1562_v58 }
 0x296   : > { %v2324_v1 = vpop.eup %2323  ;;  %v1551_v2 = vsel %vm1549_vm5, %v1550_v39, %v1548_v63  ;;  %v1574_v4 = vmul.f32 %v2322_v60, %v3114_v29  ;;  %v1797_v24 = vmul.f32 %v1765_v9, %v1565_v7  ;;  %v1599_v25 = vand.u32 2147483648, %v3137_v49 }
 0x297   : > { %2333 = vrsqrt.f32 %v3157_v61  ;;  %v1795_v5 = vmul.f32 %v1763_v57, %v1551_v2  ;;  %v1567_v6 = vmul.f32 %v2324_v1, %v3116_v30  ;;  %vm1610_vm2 = vcmp.eq.f32.partialorder %v3160_v62, inf }
 0x298   : > { %2335 = vrsqrt.f32 %v3160_v62  ;;  %v1469_v10 = vpop.xlane.xlu1 %1468  ;;  %v1467_v11 = vpop.xlane.xlu0 %1466  ;;  %v1576_v8 = vsel %vm1575_vm10, %v3114_v29, %v1574_v4  ;;  %v1592_v29 = vand.u32 2147483648, %v3120_v35  ;;  %v1613_v38 = vand.u32 2147483648, %v3160_v62 }
 0x299   : > { %v2326_v15 = vpop.eup %2325  ;;  %v3183_v16 = vmax.f32 %v1469_v10, 0.0  ;;  %1860 = vrot.lane.b32.xlu1 %v1795_v5, %s2545_s0  ;;  %v3186_v17 = vmax.f32 %v1467_v11, 0.0  ;;  %v1569_v19 = vsel %vm1568_vm8, %v3116_v30, %v1567_v6  ;;  %v1579_v20 = vsel %vm1577_vm11, %v1578_v59, %v1576_v8  ;;  %v1773_v11 = vld [vmem:[%s2740_s19 + $0x58] sm:$0xff] }
 0x29a   : > { %v2328_v22 = vpop.eup %2327  ;;  %v1572_v23 = vsel %vm1570_vm9, %v1571_v12, %v1569_v19  ;;  %v1588_v26 = vmul.f32 %v2326_v15, %v3120_v35  ;;  %v1799_v30 = vmul.f32 %v1767_v21, %v1579_v20  ;;  %vm1612_vm3 = vcmp.eq.f32.partialorder %v3160_v62, 0.0 }
 0x29b   : > { %2337 = vrsqrt.f32 %v3183_v16  ;;  %v1798_v27 = vmul.f32 %v1766_v13, %v1572_v23  ;;  %v1581_v31 = vmul.f32 %v2328_v22, %v3122_v36  ;;  %vm1603_vm4 = vcmp.eq.f32.partialorder %v3135_v48, inf  ;;  %v1774_v23 = vld [vmem:[%s2740_s19 + $0x60] sm:$0xff] }
 0x29c   : > { %2339 = vrsqrt.f32 %v3186_v17  ;;  %v1473_v32 = vpop.xlane.xlu1 %1472  ;;  %v1471_v33 = vpop.xlane.xlu0 %1470  ;;  %v1590_v37 = vsel %vm1589_vm14, %v3120_v35, %v1588_v26  ;;  %vm1605_vm5 = vcmp.eq.f32.partialorder %v3135_v48, 0.0  ;;  %v1606_v12 = vand.u32 2147483648, %v3135_v48 }
 0x29d   : > { %v2330_v39 = vpop.eup %2329  ;;  %v3209_v40 = vmax.f32 %v1473_v32, 0.0  ;;  %1862 = vrot.lane.b32.xlu1 %v1796_v3, %s2545_s0  ;;  %1866 = vrot.lane.b32.xlu0 %v1798_v27, %s2545_s0  ;;  %v3213_v41 = vmax.f32 %v1471_v33, 0.0  ;;  %v1583_v42 = vsel %vm1582_vm12, %v3122_v36, %v1581_v31  ;;  %v1593_v43 = vsel %vm1591_vm0, %v1592_v29, %v1590_v37  ;;  %v1772_v3 = vld [vmem:[%s2740_s19 + $0x50] sm:$0xff] }
 0x29e   : > { %v2332_v45 = vpop.eup %2331  ;;  %v1586_v46 = vsel %vm1584_vm13, %v1585_v0, %v1583_v42  ;;  %v1602_v47 = vmul.f32 %v2330_v39, %v3135_v48  ;;  %v1801_v36 = vmul.f32 %v1769_v44, %v1593_v43  ;;  %vm1624_vm6 = vcmp.eq.f32.partialorder %v3186_v17, inf  ;;  %v1771_v0 = vld [vmem:[%s2740_s19 + $0x48] sm:$0xff]  ;;  %v1776_v43 = vld [vmem:[%s2740_s19 + $0x70] sm:$0xff] }
 0x29f   : > { %2341 = vrsqrt.f32 %v3209_v40  ;;  %v1800_v50 = vmul.f32 %v1768_v34, %v1586_v46  ;;  %v1595_v35 = vmul.f32 %v2332_v45, %v3137_v49  ;;  %vm1626_vm7 = vcmp.eq.f32.partialorder %v3186_v17, 0.0  ;;  %v1775_v44 = vld [vmem:[%s2740_s19 + $0x68] sm:$0xff] }
 0x2a0   : > { %2343 = vrsqrt.f32 %v3213_v41  ;;  %v1477_v51 = vpop.xlane.xlu1 %1476  ;;  %v1475_v14 = vpop.xlane.xlu0 %1474  ;;  %v1604_v53 = vsel %vm1603_vm4, %v3135_v48, %v1602_v47  ;;  %vm1617_vm8 = vcmp.eq.f32.partialorder %v3157_v61, inf  ;;  %v1620_v1 = vand.u32 2147483648, %v3157_v61 }
 0x2a1   : > { %v2334_v54 = vpop.eup %2333  ;;  %v3234_v18 = vmax.f32 %v1477_v51, 0.0  ;;  %1864 = vrot.lane.b32.xlu1 %v1797_v24, %s2545_s0  ;;  %1870 = vrot.lane.b32.xlu0 %v1800_v50, %s2545_s0  ;;  %v3238_v55 = vmax.f32 %v1475_v14, 0.0  ;;  %v1597_v28 = vsel %vm1596_vm15, %v3137_v49, %v1595_v35  ;;  %v1607_v58 = vsel %vm1605_vm5, %v1606_v12, %v1604_v53 }
 0x2a2   : > { %v2336_v56 = vpop.eup %2335  ;;  %v1600_v57 = vsel %vm1598_vm1, %v1599_v25, %v1597_v28  ;;  %v1616_v59 = vmul.f32 %v2334_v54, %v3157_v61  ;;  %v1627_v48 = vand.u32 2147483648, %v3186_v17  ;;  %vm1619_vm9 = vcmp.eq.f32.partialorder %v3157_v61, 0.0  ;;  %v1777_v28 = vld [vmem:[%s2740_s19 + $0x78] sm:$0xff] }
 0x2a3   : > { %2345 = vrsqrt.f32 %v3234_v18  ;;  %v1802_v60 = vmul.f32 %v1770_v52, %v1600_v57  ;;  %v1609_v63 = vmul.f32 %v2336_v56, %v3160_v62  ;;  %v1803_v8 = vmul.f32 %v1771_v0, %v1607_v58  ;;  %v1778_v58 = vld [vmem:[%s2740_s19 + $0x80] sm:$0xff] }
 0x2a4   : > { %2347 = vrsqrt.f32 %v3238_v55  ;;  %v1481_v49 = vpop.xlane.xlu1 %1480  ;;  %v1479_v2 = vpop.xlane.xlu0 %1478  ;;  %v1618_v4 = vsel %vm1617_vm8, %v3157_v61, %v1616_v59  ;;  %vm1638_vm10 = vcmp.eq.f32.partialorder %v3213_v41, inf  ;;  %vm1640_vm11 = vcmp.eq.f32.partialorder %v3213_v41, 0.0 }
 0x2a5   : > { %v2338_v5 = vpop.eup %2337  ;;  %v3259_v6 = vmax.f32 %v1481_v49, 0.0  ;;  %1868 = vrot.lane.b32.xlu1 %v1799_v30, %s2545_s0  ;;  %1874 = vrot.lane.b32.xlu0 %v1802_v60, %s2545_s0  ;;  %v3263_v7 = vmax.f32 %v1479_v2, 0.0  ;;  %v1611_v9 = vsel %vm1610_vm2, %v3160_v62, %v1609_v63  ;;  %v1621_v10 = vsel %vm1619_vm9, %v1620_v1, %v1618_v4 }
 0x2a6   : > { %v2340_v13 = vpop.eup %2339  ;;  %v1614_v61 = vsel %vm1612_vm3, %v1613_v38, %v1611_v9  ;;  %v1630_v15 = vmul.f32 %v2338_v5, %v3183_v16  ;;  %v1805_v24 = vmul.f32 %v1773_v11, %v1621_v10  ;;  %v1641_v62 = vand.u32 2147483648, %v3213_v41  ;;  %v1780_v10 = vld [vmem:[%s2740_s19 + $0x90] sm:$0xff] }
 0x2a7   : > { %2349 = vrsqrt.f32 %v3259_v6  ;;  %v1804_v19 = vmul.f32 %v1772_v3, %v1614_v61  ;;  %v1623_v20 = vmul.f32 %v2340_v13, %v3186_v17  ;;  %vm1631_vm12 = vcmp.eq.f32.partialorder %v3183_v16, inf }
 0x2a8   : > { %2351 = vrsqrt.f32 %v3263_v7  ;;  %v1485_v21 = vpop.xlane.xlu1 %1484  ;;  %v1483_v22 = vpop.xlane.xlu0 %1482  ;;  %v1632_v29 = vsel %vm1631_vm12, %v3183_v16, %v1630_v15  ;;  %vm1633_vm13 = vcmp.eq.f32.partialorder %v3183_v16, 0.0  ;;  %v1634_v34 = vand.u32 2147483648, %v3183_v16 }
 0x2a9   : > { %v2342_v25 = vpop.eup %2341  ;;  %v3280_v26 = vmax.f32 %v1485_v21, 0.0  ;;  %1872 = vrot.lane.b32.xlu1 %v1801_v36, %s2545_s0  ;;  %1878 = vrot.lane.b32.xlu0 %v1804_v19, %s2545_s0  ;;  %v3284_v27 = vmax.f32 %v1483_v22, 0.0  ;;  %v1625_v31 = vsel %vm1624_vm6, %v3186_v17, %v1623_v20  ;;  %vm1652_vm14 = vcmp.eq.f32.partialorder %v3238_v55, inf }
 0x2aa   : > { %v2344_v32 = vpop.eup %2343  ;;  %v1628_v33 = vsel %vm1626_vm7, %v1627_v48, %v1625_v31  ;;  %v1644_v30 = vmul.f32 %v2342_v25, %v3209_v40  ;;  %v1635_v17 = vsel %vm1633_vm13, %v1634_v34, %v1632_v29  ;;  %vm1645_vm15 = vcmp.eq.f32.partialorder %v3209_v40, inf  ;;  %v1782_v29 = vld [vmem:[%s2740_s19 + $0xa0] sm:$0xff] }
 0x2ab   : > { %2353 = vrsqrt.f32 %v3280_v26  ;;  %v1806_v37 = vmul.f32 %v1774_v23, %v1628_v33  ;;  %v1637_v38 = vmul.f32 %v2344_v32, %v3213_v41  ;;  %v1648_v16 = vand.u32 2147483648, %v3209_v40 }
 0x2ac   : > { %2355 = vrsqrt.f32 %v3284_v27  ;;  %v1489_v39 = vpop.xlane.xlu1 %1488  ;;  %v1487_v42 = vpop.xlane.xlu0 %1486  ;;  %v1646_v35 = vsel %vm1645_vm15, %v3209_v40, %v1644_v30  ;;  %vm1654_vm0 = vcmp.eq.f32.partialorder %v3238_v55, 0.0  ;;  %v1655_v14 = vand.u32 2147483648, %v3238_v55 }
 0x2ad   : > { %v2346_v45 = vpop.eup %2345  ;;  %v3303_v46 = vmax.f32 %v1489_v39, 0.0  ;;  %1876 = vrot.lane.b32.xlu1 %v1803_v8, %s2545_s0  ;;  %1882 = vrot.lane.b32.xlu0 %v1806_v37, %s2545_s0  ;;  %v3307_v47 = vmax.f32 %v1487_v42, 0.0  ;;  %v1639_v50 = vsel %vm1638_vm10, %v3213_v41, %v1637_v38  ;;  %vm1647_vm1 = vcmp.eq.f32.partialorder %v3209_v40, 0.0  ;;  %v1781_v37 = vld [vmem:[%s2740_s19 + $0x98] sm:$0xff] }
 0x2ae   : > { %v2348_v12 = vpop.eup %2347  ;;  %v1642_v51 = vsel %vm1640_vm11, %v1641_v62, %v1639_v50  ;;  %v1807_v36 = vmul.f32 %v1775_v44, %v1635_v17  ;;  %v1649_v54 = vsel %vm1647_vm1, %v1648_v16, %v1646_v35  ;;  %vm1666_vm2 = vcmp.eq.f32.partialorder %v3263_v7, inf  ;;  %v1784_v35 = vld [vmem:[%s2740_s19 + $0xb0] sm:$0xff] }
 0x2af   : > { %v1808_v52 = vmul.f32 %v1776_v43, %v1642_v51  ;;  %v1651_v53 = vmul.f32 %v2348_v12, %v3238_v55  ;;  %2357 = vrsqrt.f32 %v3307_v47  ;;  %vm1668_vm3 = vcmp.eq.f32.partialorder %v3263_v7, 0.0 }
 0x2b0   : > { %v1493_v56 = vpop.xlane.xlu1 %1492  ;;  %v1491_v57 = vpop.xlane.xlu0 %1490  ;;  %v1658_v41 = vmul.f32 %v2346_v45, %v3234_v18  ;;  %2359 = vrsqrt.f32 %v3303_v46  ;;  %v1809_v49 = vmul.f32 %v1777_v28, %v1649_v54  ;;  %v1669_v2 = vand.u32 2147483648, %v3263_v7 }
 0x2b1   : > { %v2350_v59 = vpop.eup %2349  ;;  %v3326_v40 = vmax.f32 %v1493_v56, 0.0  ;;  %1880 = vrot.lane.b32.xlu1 %v1805_v24, %s2545_s0  ;;  %1886 = vrot.lane.b32.xlu0 %v1808_v52, %s2545_s0  ;;  %v3330_v60 = vmax.f32 %v1491_v57, 0.0  ;;  %v1653_v63 = vsel %vm1652_vm14, %v3238_v55, %v1651_v53  ;;  %vm1659_vm4 = vcmp.eq.f32.partialorder %v3234_v18, inf  ;;  %v1779_v24 = vld [vmem:[%s2740_s19 + $0x88] sm:$0xff] }
 0x2b2   : > { %v2352_v0 = vpop.eup %2351  ;;  %v1656_v1 = vsel %vm1654_vm0, %v1655_v14, %v1653_v63  ;;  %v1660_v4 = vsel %vm1659_vm4, %v3234_v18, %v1658_v41  ;;  %vm1661_vm5 = vcmp.eq.f32.partialorder %v3234_v18, 0.0  ;;  %v1662_v55 = vand.u32 2147483648, %v3234_v18  ;;  %v1783_v41 = vld [vmem:[%s2740_s19 + $0xa8] sm:$0xff]  ;;  %v1786_v63 = vld [vmem:[%s2740_s19 + $0xc0] sm:$0xff] }
 0x2b3   : > { %v1810_v3 = vmul.f32 %v1778_v58, %v1656_v1  ;;  %v1665_v48 = vmul.f32 %v2352_v0, %v3263_v7  ;;  %2361 = vrsqrt.f32 %v3330_v60  ;;  %vm1680_vm6 = vcmp.eq.f32.partialorder %v3284_v27, inf }
 0x2b4   : > { %v1497_v5 = vpop.xlane.xlu1 %1496  ;;  %v1495_v9 = vpop.xlane.xlu0 %1494  ;;  %v1672_v11 = vmul.f32 %v2350_v59, %v3259_v6  ;;  %2363 = vrsqrt.f32 %v3326_v40  ;;  %v1663_v21 = vsel %vm1661_vm5, %v1662_v55, %v1660_v4  ;;  %vm1673_vm7 = vcmp.eq.f32.partialorder %v3259_v6, inf  ;;  %v1785_v55 = vld [vmem:[%s2740_s19 + $0xb8] sm:$0xff] }
 0x2b5   : > { %v2354_v13 = vpop.eup %2353  ;;  %v3348_v61 = vmax.f32 %v1497_v5, 0.0  ;;  %1884 = vrot.lane.b32.xlu1 %v1807_v36, %s2545_s0  ;;  %1890 = vrot.lane.b32.xlu0 %v1810_v3, %s2545_s0  ;;  %v3352_v8 = vmax.f32 %v1495_v9, 0.0  ;;  %v1667_v15 = vsel %vm1666_vm2, %v3263_v7, %v1665_v48  ;;  %v1676_v22 = vand.u32 2147483648, %v3259_v6 }
 0x2b6   : > { %v2356_v19 = vpop.eup %2355  ;;  %v1670_v20 = vsel %vm1668_vm3, %v1669_v2, %v1667_v15  ;;  %v1674_v25 = vsel %vm1673_vm7, %v3259_v6, %v1672_v11  ;;  %vm1682_vm8 = vcmp.eq.f32.partialorder %v3284_v27, 0.0  ;;  %v1683_v18 = vand.u32 2147483648, %v3284_v27  ;;  %v1788_v11 = vld [vmem:[%s2740_s19 + $0xd0] sm:$0xff] }
 0x2b7   : > { %2365 = vrsqrt.f32 %v3348_v61  ;;  %v1812_v23 = vmul.f32 %v1780_v10, %v1670_v20  ;;  %v1679_v62 = vmul.f32 %v2356_v19, %v3284_v27  ;;  %vm1675_vm9 = vcmp.eq.f32.partialorder %v3259_v6, 0.0 }
 0x2b8   : > { %2367 = vrsqrt.f32 %v3352_v8  ;;  %v1501_v7 = vpop.xlane.xlu1 %1500  ;;  %v1499_v31 = vpop.xlane.xlu0 %1498  ;;  %v1677_v30 = vsel %vm1675_vm9, %v1676_v22, %v1674_v25  ;;  %v1811_v39 = vmul.f32 %v1779_v24, %v1663_v21  ;;  %vm1694_vm10 = vcmp.eq.f32.partialorder %v3307_v47, inf }
 0x2b9   : > { %v3372_v32 = vmax.f32 %v1501_v7, 0.0  ;;  %1888 = vrot.lane.b32.xlu1 %v1809_v49, %s2545_s0  ;;  %1894 = vrot.lane.b32.xlu0 %v1812_v23, %s2545_s0  ;;  %v3376_v33 = vmax.f32 %v1499_v31, 0.0  ;;  %v1681_v34 = vsel %vm1680_vm6, %v3284_v27, %v1679_v62  ;;  %v2358_v38 = vpop.eup %2357  ;;  %v1686_v6 = vmul.f32 %v2354_v13, %v3280_v26  ;;  %v1787_v7 = vld [vmem:[%s2740_s19 + $0xc8] sm:$0xff]  ;;  %v1790_v31 = vld [vmem:[%s2740_s19 + $0xe0] sm:$0xff] }
 0x2ba   : > { %v1684_v42 = vsel %vm1682_vm8, %v1683_v18, %v1681_v34  ;;  %v2360_v43 = vpop.eup %2359  ;;  %v1693_v44 = vmul.f32 %v2358_v38, %v3307_v47  ;;  %vm1696_vm11 = vcmp.eq.f32.partialorder %v3307_v47, 0.0  ;;  %v1813_v45 = vmul.f32 %v1781_v37, %v1677_v30 }
 0x2bb   : > { %2369 = vrsqrt.f32 %v3372_v32  ;;  %v1814_v17 = vmul.f32 %v1782_v29, %v1684_v42  ;;  %v1697_v50 = vand.u32 2147483648, %v3307_v47  ;;  %vm1687_vm12 = vcmp.eq.f32.partialorder %v3280_v26, inf }
 0x2bc   : > { %2371 = vrsqrt.f32 %v3376_v33  ;;  %v1505_v27 = vpop.xlane.xlu1 %1504  ;;  %v1503_v16 = vpop.xlane.xlu0 %1502  ;;  %v1695_v14 = vsel %vm1694_vm10, %v3307_v47, %v1693_v44  ;;  %v1688_v52 = vsel %vm1687_vm12, %v3280_v26, %v1686_v6  ;;  %vm1689_vm13 = vcmp.eq.f32.partialorder %v3280_v26, 0.0  ;;  %v1792_v44 = vld [vmem:[%s2740_s19 + $0xf0] sm:$0xff] }
 0x2bd   : > { %v3391_v12 = vmax.f32 %v1505_v27, 0.0  ;;  %1892 = vrot.lane.b32.xlu1 %v1811_v39, %s2545_s0  ;;  %1898 = vrot.lane.b32.xlu0 %v1814_v17, %s2545_s0  ;;  %v3395_v51 = vmax.f32 %v1503_v16, 0.0  ;;  %v2362_v36 = vpop.eup %2361  ;;  %v1698_v53 = vsel %vm1696_vm11, %v1697_v50, %v1695_v14  ;;  %v1690_v54 = vand.u32 2147483648, %v3280_v26  ;;  %v1789_v17 = vld [vmem:[%s2740_s19 + $0xd8] sm:$0xff] }
 0x2be   : > { %v1700_v28 = vmul.f32 %v2360_v43, %v3303_v46  ;;  %v2364_v56 = vpop.eup %2363  ;;  %v1816_v57 = vmul.f32 %v1784_v35, %v1698_v53  ;;  %v1707_v58 = vmul.f32 %v2362_v36, %v3330_v60  ;;  %vm1708_vm14 = vcmp.eq.f32.partialorder %v3330_v60, inf  ;;  %v1791_v36 = vld [vmem:[%s2740_s19 + $0xe8] sm:$0xff] }
 0x2bf   : > { %2373 = vrsqrt.f32 %v3391_v12  ;;  %v1691_v47 = vsel %vm1689_vm13, %v1690_v54, %v1688_v52  ;;  %v1711_v59 = vand.u32 2147483648, %v3330_v60  ;;  %vm1701_vm15 = vcmp.eq.f32.partialorder %v3303_v46, inf }
 0x2c0   : > { %2375 = vrsqrt.f32 %v3395_v51  ;;  %v1709_v0 = vsel %vm1708_vm14, %v3330_v60, %v1707_v58  ;;  %vm1710_vm0 = vcmp.eq.f32.partialorder %v3330_v60, 0.0  ;;  %v1702_v1 = vsel %vm1701_vm15, %v3303_v46, %v1700_v28 }
 0x2c1   : > { %v2366_v26 = vpop.eup %2365  ;;  %1896 = vrot.lane.b32.xlu1 %v1813_v45, %s2545_s0  ;;  %1902 = vrot.lane.b32.xlu0 %v1816_v57, %s2545_s0  ;;  %v1712_v2 = vsel %vm1710_vm0, %v1711_v59, %v1709_v0  ;;  %v1704_v3 = vand.u32 2147483648, %v3303_v46  ;;  %v1714_v48 = vmul.f32 %v2364_v56, %v3326_v40  ;;  %v1815_v4 = vmul.f32 %v1783_v41, %v1691_v47  ;;  %v1793_v56 = vld [vmem:[%s2740_s19 + $0xf8] sm:$0xff]  ;;  %s2449_s19 = sshll.u32 %s2546_s17, 4  ;;  %s2450_s19 = int_to_ptr.vmem [resolvable:$false] %s2449_s19 }
 0x2c2   : > { %v2368_v49 = vpop.eup %2367  ;;  %v1818_v5 = vmul.f32 %v1786_v63, %v1712_v2  ;;  %vm1703_vm1 = vcmp.eq.f32.partialorder %v3303_v46, 0.0  ;;  %vm1722_vm2 = vcmp.eq.f32.partialorder %v3352_v8, inf  ;;  %v1725_v60 = vand.u32 2147483648, %v3352_v8  ;;  %s2451_s10 = scalar_lea.vmem %s2450_s19, 32  ;;  %p2452_p8 = scmp.lt.s32.totalorder %s3512_s20, %s2450_s19 }
 0x2c3   : > { %v1721_v9 = vmul.f32 %v2368_v49, %v3352_v8  ;;  %v1705_v10 = vsel %vm1703_vm1, %v1704_v3, %v1702_v1  ;;  %vm1715_vm3 = vcmp.eq.f32.partialorder %v3326_v40, inf  ;;  %vm1724_vm4 = vcmp.eq.f32.partialorder %v3352_v8, 0.0  ;;  %p2453_p12 = scmp.lt.s32.totalorder %s2451_s10, %s2445_s28 }
 0x2c4   : > { %v1716_v15 = vsel %vm1715_vm3, %v3326_v40, %v1714_v48  ;;  %v1728_v19 = vmul.f32 %v2366_v26, %v3348_v61  ;;  %v1718_v22 = vand.u32 2147483648, %v3326_v40  ;;  %v1817_v23 = vmul.f32 %v1785_v55, %v1705_v10 }
 0x2c5   : > { %v2370_v13 = vpop.eup %2369  ;;  %1900 = vrot.lane.b32.xlu1 %v1815_v4, %s2545_s0  ;;  %1906 = vrot.lane.b32.xlu0 %v1818_v5, %s2545_s0  ;;  %v1723_v46 = vsel %vm1722_vm2, %v3352_v8, %v1721_v9  ;;  %vm1717_vm5 = vcmp.eq.f32.partialorder %v3326_v40, 0.0  ;;  %vm1736_vm6 = vcmp.eq.f32.partialorder %v3376_v33, inf  ;;  %v1739_v8 = vand.u32 2147483648, %v3376_v33  ;;  %p2454_p4 = por %p2453_p12, %p2452_p8 }
 0x2c6   : > { %v2372_v20 = vpop.eup %2371  ;;  %v1726_v21 = vsel %vm1724_vm4, %v1725_v60, %v1723_v46  ;;  %v1719_v25 = vsel %vm1717_vm5, %v1718_v22, %v1716_v15  ;;  %vm1729_vm7 = vcmp.eq.f32.partialorder %v3348_v61, inf  ;;  %vm1738_vm8 = vcmp.eq.f32.partialorder %v3376_v33, 0.0 }
 0x2c7   : > { %v1820_v24 = vmul.f32 %v1788_v11, %v1726_v21  ;;  %v1735_v62 = vmul.f32 %v2372_v20, %v3376_v33  ;;  %v1730_v29 = vsel %vm1729_vm7, %v3348_v61, %v1728_v19  ;;  %v1742_v34 = vmul.f32 %v2370_v13, %v3372_v32  ;;  %p2455_p5 = pnand %p2454_p4, %p2448_p3 }
 0x2c8   : > { %v1732_v38 = vand.u32 2147483648, %v3348_v61  ;;  %v1819_v39 = vmul.f32 %v1787_v7, %v1719_v25  ;;  %vm1731_vm9 = vcmp.eq.f32.partialorder %v3348_v61, 0.0  ;;  %vm1750_vm10 = vcmp.eq.f32.partialorder %v3395_v51, inf }
 0x2c9   : > { %v2374_v18 = vpop.eup %2373  ;;  %1904 = vrot.lane.b32.xlu1 %v1817_v23, %s2545_s0  ;;  %1910 = vrot.lane.b32.xlu0 %v1820_v24, %s2545_s0  ;;  %v1737_v40 = vsel %vm1736_vm6, %v3376_v33, %v1735_v62  ;;  %v1753_v33 = vand.u32 2147483648, %v3395_v51  ;;  %vm1743_vm11 = vcmp.eq.f32.partialorder %v3372_v32, inf  ;;  %vm1752_vm12 = vcmp.eq.f32.partialorder %v3395_v51, 0.0 }
 0x2ca   : > { %v2376_v30 = vpop.eup %2375  ;;  %v1740_v37 = vsel %vm1738_vm8, %v1739_v8, %v1737_v40  ;;  %v1733_v43 = vsel %vm1731_vm9, %v1732_v38, %v1730_v29  ;;  %v1744_v61 = vsel %vm1743_vm11, %v3372_v32, %v1742_v34  ;;  %v1756_v16 = vmul.f32 %v2374_v18, %v3391_v12 }
 0x2cb   : > { %v1822_v42 = vmul.f32 %v1790_v31, %v1740_v37  ;;  %v1749_v6 = vmul.f32 %v2376_v30, %v3395_v51  ;;  %v1746_v50 = vand.u32 2147483648, %v3372_v32  ;;  %v1821_v35 = vmul.f32 %v1789_v17, %v1733_v43 }
 0x2cc   : > { %vm1745_vm13 = vcmp.eq.f32.partialorder %v3372_v32, 0.0  ;;  %vm1757_vm14 = vcmp.eq.f32.partialorder %v3391_v12, inf  ;;  %v1760_v53 = vand.u32 2147483648, %v3391_v12  ;;  %vm1759_vm15 = vcmp.eq.f32.partialorder %v3391_v12, 0.0 }
 0x2cd   : > { %1908 = vrot.lane.b32.xlu1 %v1819_v39, %s2545_s0  ;;  %1914 = vrot.lane.b32.xlu0 %v1822_v42, %s2545_s0  ;;  %v1751_v27 = vsel %vm1750_vm10, %v3395_v51, %v1749_v6  ;;  %v1747_v52 = vsel %vm1745_vm13, %v1746_v50, %v1744_v61  ;;  %v1758_v51 = vsel %vm1757_vm14, %v3391_v12, %v1756_v16  ;;  %vm1954_vm0 = vcmask 7168  }
 0x2ce   : > { %v1754_v45 = vsel %vm1752_vm12, %v1753_v33, %v1751_v27  ;;  %v1823_v54 = vmul.f32 %v1791_v36, %v1747_v52  ;;  %v1761_v28 = vsel %vm1759_vm15, %v1760_v53, %v1758_v51 }
 0x2cf   : > { %v1824_v14 = vmul.f32 %v1792_v44, %v1754_v45  ;;  %v1825_v32 = vmul.f32 %v1793_v56, %v1761_v28 }
 0x2d1   : > { %1912 = vrot.lane.b32.xlu1 %v1821_v35, %s2545_s0  ;;  %1918 = vrot.lane.b32.xlu0 %v1824_v14, %s2545_s0 }
 0x2d5   : > { %1916 = vrot.lane.b32.xlu1 %v1823_v54, %s2545_s0 }
 0x2d9   : > { %1920 = vrot.lane.b32.xlu1 %v1825_v32, %s2545_s0 }
 0x307   : > { %v1859_v57 = vpop.permute.xlu0 %1858 }
 0x308   : > { %v1955_v63 = vsel %vm1954_vm0, %v1859_v57, 0.0 }
 0x30b   : > { %v1861_v58 = vpop.permute.xlu1 %1860 }
 0x30c   : > { %v1956_v47 = vsel %vm1954_vm0, %v1861_v58, 0.0 }
 0x30d   : > { %v1957_v0 = vadd.f32 %v1956_v47, %v1955_v63 }
 0x30f   : > { %v1863_v41 = vpop.permute.xlu1 %1862  ;;  %v1867_v59 = vpop.permute.xlu0 %1866 }
 0x310   : > { %v1958_v26 = vsel %vm1954_vm0, %v1863_v41, 0.0  ;;  %v1962_v48 = vsel %vm1954_vm0, %v1867_v59, 0.0 }
 0x311   : > { %v1959_v12 = vadd.f32 %v1958_v26, %v1957_v0 }
 0x313   : > { %v1865_v1 = vpop.permute.xlu1 %1864  ;;  %v1871_v49 = vpop.permute.xlu0 %1870 }
 0x314   : > { %v1960_v2 = vsel %vm1954_vm0, %v1865_v1, 0.0  ;;  %v1966_v60 = vsel %vm1954_vm0, %v1871_v49, 0.0 }
 0x315   : > { %v1961_v3 = vadd.f32 %v1960_v2, %v1959_v12 }
 0x317   : > { %v1869_v4 = vpop.permute.xlu1 %1868  ;;  %v1963_v5 = vadd.f32 %v1962_v48, %v1961_v3  ;;  %v1875_v9 = vpop.permute.xlu0 %1874 }
 0x318   : > { %v1964_v10 = vsel %vm1954_vm0, %v1869_v4, 0.0  ;;  %v1970_v20 = vsel %vm1954_vm0, %v1875_v9, 0.0 }
 0x319   : > { %v1965_v55 = vadd.f32 %v1964_v10, %v1963_v5 }
 0x31b   : > { %v1873_v11 = vpop.permute.xlu1 %1872  ;;  %v1967_v13 = vadd.f32 %v1966_v60, %v1965_v55  ;;  %v1879_v46 = vpop.permute.xlu0 %1878 }
 0x31c   : > { %v1968_v15 = vsel %vm1954_vm0, %v1873_v11, 0.0  ;;  %v1974_v25 = vsel %vm1954_vm0, %v1879_v46, 0.0 }
 0x31d   : > { %v1969_v19 = vadd.f32 %v1968_v15, %v1967_v13 }
 0x31f   : > { %v1877_v21 = vpop.permute.xlu1 %1876  ;;  %v1971_v22 = vadd.f32 %v1970_v20, %v1969_v19  ;;  %v1883_v23 = vpop.permute.xlu0 %1882 }
 0x320   : > { %v1972_v24 = vsel %vm1954_vm0, %v1877_v21, 0.0  ;;  %v1978_v29 = vsel %vm1954_vm0, %v1883_v23, 0.0 }
 0x321   : > { %v1973_v62 = vadd.f32 %v1972_v24, %v1971_v22 }
 0x323   : > { %v1881_v7 = vpop.permute.xlu1 %1880  ;;  %v1975_v8 = vadd.f32 %v1974_v25, %v1973_v62  ;;  %v1887_v31 = vpop.permute.xlu0 %1886 }
 0x324   : > { %v1976_v18 = vsel %vm1954_vm0, %v1881_v7, 0.0  ;;  %v1982_v42 = vsel %vm1954_vm0, %v1887_v31, 0.0 }
 0x325   : > { %v1977_v40 = vadd.f32 %v1976_v18, %v1975_v8 }
 0x327   : > { %v1885_v34 = vpop.permute.xlu1 %1884  ;;  %v1979_v30 = vadd.f32 %v1978_v29, %v1977_v40  ;;  %v1891_v37 = vpop.permute.xlu0 %1890 }
 0x328   : > { %v1980_v38 = vsel %vm1954_vm0, %v1885_v34, 0.0  ;;  %v1986_v27 = vsel %vm1954_vm0, %v1891_v37, 0.0  ;;  %v2027_v34 = vlaneseq }
 0x329   : > { %v1981_v39 = vadd.f32 %v1980_v38, %v1979_v30 }
 0x32a   : > { %v2028_v30 = vand.u32 127, %v2027_v34 }
 0x32b   : > { %v1889_v6 = vpop.permute.xlu1 %1888  ;;  %v1983_v43 = vadd.f32 %v1982_v42, %v1981_v39  ;;  %v1895_v17 = vpop.permute.xlu0 %1894 }
 0x32c   : > { %v1984_v33 = vsel %vm1954_vm0, %v1889_v6, 0.0  ;;  %v1990_v14 = vsel %vm1954_vm0, %v1895_v17, 0.0  ;;  %vm2029_vm1 = vcmp.eq.s32.totalorder %v2028_v30, 0 }
 0x32d   : > { %v1985_v44 = vadd.f32 %v1984_v33, %v1983_v43 }
 0x32f   : > { %v1893_v61 = vpop.permute.xlu1 %1892  ;;  %v1987_v16 = vadd.f32 %v1986_v27, %v1985_v44  ;;  %v1899_v45 = vpop.permute.xlu0 %1898 }
 0x330   : > { %v1988_v50 = vsel %vm1954_vm0, %v1893_v61, 0.0  ;;  %v1994_v28 = vsel %vm1954_vm0, %v1899_v45, 0.0 }
 0x331   : > { %v1989_v35 = vadd.f32 %v1988_v50, %v1987_v16 }
 0x333   : > { %v1897_v52 = vpop.permute.xlu1 %1896  ;;  %v1991_v36 = vadd.f32 %v1990_v14, %v1989_v35  ;;  %v1903_v51 = vpop.permute.xlu0 %1902 }
 0x334   : > { %v1992_v53 = vsel %vm1954_vm0, %v1897_v52, 0.0  ;;  %v1998_v41 = vsel %vm1954_vm0, %v1903_v51, 0.0 }
 0x335   : > { %v1993_v54 = vadd.f32 %v1992_v53, %v1991_v36 }
 0x337   : > { %v1901_v56 = vpop.permute.xlu1 %1900  ;;  %v1995_v32 = vadd.f32 %v1994_v28, %v1993_v54  ;;  %v1907_v57 = vpop.permute.xlu0 %1906 }
 0x338   : > { %v1996_v58 = vsel %vm1954_vm0, %v1901_v56, 0.0  ;;  %v2002_v1 = vsel %vm1954_vm0, %v1907_v57, 0.0 }
 0x339   : > { %v1997_v47 = vadd.f32 %v1996_v58, %v1995_v32 }
 0x33b   : > { %v1905_v59 = vpop.permute.xlu1 %1904  ;;  %v1999_v63 = vadd.f32 %v1998_v41, %v1997_v47  ;;  %v1911_v26 = vpop.permute.xlu0 %1910 }
 0x33c   : > { %v2000_v0 = vsel %vm1954_vm0, %v1905_v59, 0.0  ;;  %v2006_v5 = vsel %vm1954_vm0, %v1911_v26, 0.0 }
 0x33d   : > { %v2001_v12 = vadd.f32 %v2000_v0, %v1999_v63 }
 0x33f   : > { %v1909_v49 = vpop.permute.xlu1 %1908  ;;  %v2003_v2 = vadd.f32 %v2002_v1, %v2001_v12  ;;  %v1915_v4 = vpop.permute.xlu0 %1914 }
 0x340   : > { %v2004_v3 = vsel %vm1954_vm0, %v1909_v49, 0.0  ;;  %v2010_v11 = vsel %vm1954_vm0, %v1915_v4, 0.0 }
 0x341   : > { %v2005_v48 = vadd.f32 %v2004_v3, %v2003_v2 }
 0x343   : > { %v1913_v9 = vpop.permute.xlu1 %1912  ;;  %v2007_v10 = vadd.f32 %v2006_v5, %v2005_v48  ;;  %v1919_v13 = vpop.permute.xlu0 %1918 }
 0x344   : > { %v2008_v55 = vsel %vm1954_vm0, %v1913_v9, 0.0  ;;  %v2014_v21 = vsel %vm1954_vm0, %v1919_v13, 0.0 }
 0x345   : > { %v2009_v60 = vadd.f32 %v2008_v55, %v2007_v10 }
 0x347   : > { %v1917_v46 = vpop.permute.xlu1 %1916  ;;  %v2011_v15 = vadd.f32 %v2010_v11, %v2009_v60 }
 0x348   : > { %v2012_v19 = vsel %vm1954_vm0, %v1917_v46, 0.0 }
 0x349   : > { %v2013_v20 = vadd.f32 %v2012_v19, %v2011_v15 }
 0x34b   : > { %v1921_v22 = vpop.permute.xlu1 %1920  ;;  %v2015_v23 = vadd.f32 %v2014_v21, %v2013_v20 }
 0x34c   : > { %v2016_v24 = vsel %vm1954_vm0, %v1921_v22, 0.0 }
 0x34d   : > { %v2017_v62 = vadd.f32 %v2016_v24, %v2015_v23 }
 0x34f   : > { %2018 = vadd.xlane.f32.xlu0 %v2017_v62 }
 0x3dc   : > { %v2019_v25 = vpop.xlane.xlu0 %2018 }
 0x3dd   : > { %v2020_v7 = vrot.slane %v2019_v25, 4 }
 0x3df   : > { %v2021_v8 = vadd.f32 %v2020_v7, %v2019_v25 }
 0x3e1   : > { %v2022_v31 = vrot.slane %v2021_v8, 2 }
 0x3e3   : > { %v2023_v18 = vadd.f32 %v2022_v31, %v2021_v8 }
 0x3e5   : > { %v2024_v40 = vrot.slane %v2023_v18, 1 }
 0x3e7   : > { %v2025_v29 = vadd.f32 %v2024_v40, %v2023_v18 }
 0x3e9   : > { %2227 = vpush %v2025_v29 }
 0x41a   : > { %s2228_s21 = spop %2227 }
 0x41b   : > { %v2030_v37 = vstv %s2228_s21 }
 0x41c   : > { %v2031_v38 = vsel %vm2029_vm1, %v2030_v37, 0.0 }
 0x41d   : > { %2032 = vst [vmem:[%s241_s8] sm:$0x1] %v2031_v38 }
 0x41e   : > { %2458 = shalt.err (!%p2455_p5)
}
 0x41f   : > { %s2459_s13 = scalar_lea.hbm %s3510_s11, 16  ;;  %s2463_s8 = scalar_lea.hbm %s3565_s4, 32 }
 0x420   : > { %p2460_p6 = scmp.ne.s32.totalorder %s3510_s11, %s2459_s13  ;;  %p2464_p7 = scmp.lt.u32.totalorder %s3510_s11, %s3565_s4 }
 0x421   : > { %p2465_p9 = scmp.lt.u32.totalorder %s2463_s8, %s2459_s13  ;;  %p2467_p1 = scmp.lt.u32.totalorder %s2459_s13, %s3510_s11 }
 0x422   : > { %p2461_p10 = pnand %p2460_p6, %p2680_p13 }
 0x423   : > { %p2466_p11 = por %p2465_p9, %p2464_p7 }
 0x424   : > { %p2462_p2 = pneg %p2461_p10 }
 0x425   : > { %p2468_p0 = por %p2467_p1, %p2466_p11 }
 0x427   : > { %p2469_p3 = pnand %p2468_p0, %p2462_p2 }
 0x429   : > { %2472 = shalt.err (!%p2469_p3)
}
 0x42a   : > { %2235 = dma.vmem_to_hbm [thread:$0]  (%p2680_p13), %s3512_s20, 16, %s3510_s11, %s2034_s15  }
 0x42b PF: > { %s2058_s0 = sand.u32 1, %s2513_s25   ;;  %p3583_p8 = scmp.ne.s32.totalorder %s3573_s9, 0 }
 0x42c   : > { %p3584_p12 = scmp.ge.s32.totalorder %s2533_s30, 2  ;;  %s2059_s12 = scalar_lea.sflag [#allocation7], %s2058_s0 }
 0x42e   : > { %p2246_p4 = pnand %p3584_p12, %p3583_p8 }
 0x430   : > { %2508 = dma.done.wait (!%p2246_p4), %s2059_s12, 16  }
 0x431   : > { %2510 = vsyncadd (!%p2246_p4), %s2059_s12, 4294967280  ;;  %s25_s30 = sadd.s32 1, %s2533_s30   ;;  %s3585_s25 = smov %s2517_s26 }
 0x432   : > { %p22_p5 = scmp.ge.s32.totalorder %s25_s30, 4   ;;  %s3586_s26 = smov %s2521_s27 }
 0x433   : > { %s3587_s27 = smov %s2689_s18  ;;  %s3588_s28 = smov %s2529_s29 }
 0x434   : > { %s3589_s29 = smov %s3591_s14  ;;  %24 = sbr.rel (!%p22_p5) target bundleno = 19 (0x13), region = 97 }
 0x43b   :  { %2063 = vsyncpa [#allocation6], 1 }
 0x43c   :  { %2065 = vsyncpa [#allocation6 + $0x1], 1 }
 0x43d   :  { %2066 = vsyncpa [#allocation9], 1 }
 0x43e   :  { %2067 = vsyncpa [#allocation7], 1 }
 0x43f   :  { %2069 = vsyncpa [#allocation7 + $0x1], 1 }

</bundles_post_ra>
